<compile_context>
chip_gen: v6e
topology: v6e:2x2x1
jax: 0.10.0
libtpu: 0.0.40
codegen_flags: <defaults>
</compile_context>

<pallas_src>
import math

import jax
import jax.numpy as jnp
from jax.experimental import pallas as pl
from jax.experimental.pallas import tpu as pltpu


def _pos_embed_kernel(y_ref, x_ref, coef_ref, out_ref):
    """One grid step == (batch b, H-tile i).

    y_ref / x_ref : (tH, W, 1)  f32  row/col cumsum embeddings (already
                                     normalized & scaled in the wrapper)
    coef_ref      : (3, 1, 2F)  f32  rows: [coef_y, coef_x, phase]
    out_ref       : (tH, W, 2F) f32  NHWC tile (2F on the lane axis)
    """
    ye = y_ref[...]                 # (tH, W, 1)
    xe = x_ref[...]                 # (tH, W, 1)
    coef_y = coef_ref[0:1]          # (1, 1, 2F)  1/dim_t on y half, 0 on x half
    coef_x = coef_ref[1:2]          # (1, 1, 2F)  0 on y half, 1/dim_t on x half
    phase = coef_ref[2:3]           # (1, 1, 2F)  0.0 (even -> sin) or pi/2 (odd -> cos)

    # out[h, w, c] = sin(y_embed*coef_y[c] + x_embed*coef_x[c] + phase[c])
    # (cos(x) == sin(x + pi/2); exactly one EUP transcendental per element.)
    out_ref[...] = jnp.sin(ye * coef_y + xe * coef_x + phase)


def _choose_tile_h(H, W, F, tile_h=None, vmem_budget_bytes=8 << 20):
    """Pick an H-tile: a multiple of 8 that divides H and keeps the
    double-buffered output + embed blocks well under the scoped-VMEM limit
    (conservative enough for v5e's 16 MiB default and v7x's 64 MiB VMEM)."""
    if tile_h is not None:
        if H % tile_h == 0 and (tile_h % 8 == 0 or tile_h == H):
            return tile_h
        return H
    row_bytes = W * (2 * F + 2) * 4            # one H-row of output + 2 embeds, f32
    cap = max(8, (vmem_budget_bytes // (2 * row_bytes)) // 8 * 8)
    if H % 8 != 0 or H <= cap:
        return H
    th = min(cap, (H // 8) * 8)
    while th > 8 and H % th != 0:
        th -= 8
    return th if (th > 0 and H % th == 0) else H


def position_embedding_sine(mask, *, num_pos_feats=64, temperature=10000,
                            normalize=False, scale=None, multi_frame=False,
                            tile_h=None, channels_last=False):
    """Pallas implementation of PositionEmbeddingSine.forward.

    mask: bool [B, H, W]  (True = padding, as in NestedTensor.mask)
    returns: float32 [B, 2*num_pos_feats, H, W] (NCHW, like PyTorch), or
             [B, H, W, 2*num_pos_feats] if channels_last=True.
    """
    if scale is not None and not normalize:
        raise ValueError("normalize should be True if scale is passed")
    if scale is None:
        scale = 2 * math.pi

    B, H, W = mask.shape
    F = num_pos_feats
    C = 2 * F

    # --- cheap prep in the wrapper (bytes here are ~1/(2F) of the output) ----
    not_mask = (~mask).astype(jnp.float32)                   # (B, H, W)
    y_embed = jnp.cumsum(not_mask, axis=1)
    x_embed = jnp.cumsum(not_mask, axis=2)
    if normalize:
        eps = 1e-6
        y_embed = y_embed / (y_embed[:, -1:, :] + eps) * scale
        x_embed = x_embed / (x_embed[:, :, -1:] + eps) * scale
    y_embed = y_embed[..., None]                              # (B, H, W, 1)
    x_embed = x_embed[..., None]                              # (B, H, W, 1)

    # Per-channel constants: 1/dim_t (f32 reciprocal), sin/cos phase, and the
    # y-half / x-half selection folded into the coefficients.
    i2 = jnp.arange(C, dtype=jnp.int32) % F                   # dim index per channel
    dim_t = temperature ** (2.0 * jnp.floor(i2.astype(jnp.float32) / 2.0) / F)
    inv_dim_t = 1.0 / dim_t                                   # (2F,)
    phase = jnp.where(i2 % 2 == 1, jnp.float32(0.5 * math.pi), jnp.float32(0.0))
    is_y = (jnp.arange(C) < F).astype(jnp.float32)            # (2F,)
    coef_y = inv_dim_t * is_y
    coef_x = inv_dim_t * (1.0 - is_y)
    coef = jnp.stack([coef_y, coef_x, phase], axis=0)[:, None, :]   # (3, 1, 2F)

    tH = _choose_tile_h(H, W, F, tile_h)
    grid = (B, H // tH)

    pos_nhwc = pl.pallas_call(
        _pos_embed_kernel,
        out_shape=jax.ShapeDtypeStruct((B, H, W, C), jnp.float32),
        grid=grid,
        in_specs=[
            pl.BlockSpec((None, tH, W, 1), lambda b, i: (b, i, 0, 0)),
            pl.BlockSpec((None, tH, W, 1), lambda b, i: (b, i, 0, 0)),
            pl.BlockSpec((3, 1, C), lambda b, i: (0, 0, 0)),
        ],
        out_specs=pl.BlockSpec((None, tH, W, C), lambda b, i: (b, i, 0, 0)),
        compiler_params=pltpu.CompilerParams(
            dimension_semantics=("parallel", "parallel")),
    )(y_embed, x_embed, coef)

    if multi_frame:
        # PyTorch: pos[-1].add_(self.segment_embdded_factor); factor == 0.0,
        # so this is a mathematical no-op -- keep only the shape assert.
        assert B == 2

    if channels_last:
        return pos_nhwc
    # NCHW to match the module's `.permute(0, 3, 1, 2)` output convention.
    return jnp.transpose(pos_nhwc, (0, 3, 1, 2))


def _reference(mask, *, num_pos_feats=64, temperature=10000,
               normalize=False, scale=None):
    """Pure-JAX transcription of the PyTorch forward (for verification)."""
    if scale is None:
        scale = 2 * math.pi
    not_mask = (~mask).astype(jnp.float32)
    y_embed = jnp.cumsum(not_mask, axis=1)
    x_embed = jnp.cumsum(not_mask, axis=2)
    if normalize:
        eps = 1e-6
        y_embed = y_embed / (y_embed[:, -1:, :] + eps) * scale
        x_embed = x_embed / (x_embed[:, :, -1:] + eps) * scale
    i = jnp.arange(num_pos_feats, dtype=jnp.float32)
    dim_t = temperature ** (2.0 * jnp.floor(i / 2.0) / num_pos_feats)
    pos_x = x_embed[:, :, :, None] / dim_t
    pos_y = y_embed[:, :, :, None] / dim_t
    B, H, W = mask.shape
    pos_x = jnp.stack([jnp.sin(pos_x[..., 0::2]), jnp.cos(pos_x[..., 1::2])],
                      axis=4).reshape(B, H, W, num_pos_feats)
    pos_y = jnp.stack([jnp.sin(pos_y[..., 0::2]), jnp.cos(pos_y[..., 1::2])],
                      axis=4).reshape(B, H, W, num_pos_feats)
    return jnp.transpose(jnp.concatenate([pos_y, pos_x], axis=3), (0, 3, 1, 2))


if __name__ == "__main__":
    B, C_img, H, W = 2, 4, 16, 16
    num_pos_feats = 64

    key = jax.random.PRNGKey(0)
    kx, km = jax.random.split(key)
    # x is only used for device/dtype in the torch module; build it for parity.
    x = jax.random.normal(kx, (B, C_img, H, W), dtype=jnp.float32)
    # Padding-style boolean mask (True = padded), deterministic.
    mask = jax.random.bernoulli(km, p=0.3, shape=(B, H, W))

    pos = position_embedding_sine(mask, num_pos_feats=num_pos_feats,
                                  normalize=True, multi_frame=True, tile_h=8)
    pos = jax.block_until_ready(pos)

    ref = _reference(mask, num_pos_feats=num_pos_feats, normalize=True)
    assert pos.shape == (B, 2 * num_pos_feats, H, W)
    assert pos.dtype == jnp.float32
    assert jnp.allclose(pos, ref, atol=2e-5, rtol=1e-5)

    print("KERNEL_OK")
</pallas_src>

<mosaic_0001>
module attributes {stable_mosaic.version = 11 : i64} {
  func.func @_pos_embed_kernel(%arg0: i32, %arg1: i32, %arg2: memref<1x8x16x1xf32, #tpu.memory_space<vmem>>, %arg3: memref<1x8x16x1xf32, #tpu.memory_space<vmem>>, %arg4: memref<3x1x128xf32, #tpu.memory_space<vmem>>, %arg5: memref<1x8x16x128xf32, #tpu.memory_space<vmem>>) attributes {dimension_semantics = [#tpu.dimension_semantics<parallel>, #tpu.dimension_semantics<parallel>], iteration_bounds = array<i64: 2, 2>, scalar_prefetch = 0 : i64, scratch_operands = 0 : i64, tpu.core_type = #tpu.core_type<tc>, window_params = [{transform_indices = @transform_0, window_bounds = array<i64: 1, 8, 16, 1>}, {transform_indices = @transform_1, window_bounds = array<i64: 1, 8, 16, 1>}, {pipeline_mode = #tpu.pipeline_mode<synchronous>, transform_indices = @transform_2, window_bounds = array<i64: 3, 1, 128>}, {transform_indices = @transform_3, window_bounds = array<i64: 1, 8, 16, 128>}]} {
    %c0 = arith.constant 0 : index
    %c0_0 = arith.constant 0 : index
    %c0_1 = arith.constant 0 : index
    %c0_2 = arith.constant 0 : index
    %0 = vector.load %arg2[%c0, %c0_0, %c0_1, %c0_2] : memref<1x8x16x1xf32, #tpu.memory_space<vmem>>, vector<1x8x16x1xf32>
    %1 = vector.shape_cast %0 : vector<1x8x16x1xf32> to vector<8x16x1xf32>
    %c0_3 = arith.constant 0 : index
    %c0_4 = arith.constant 0 : index
    %c0_5 = arith.constant 0 : index
    %c0_6 = arith.constant 0 : index
    %2 = vector.load %arg3[%c0_3, %c0_4, %c0_5, %c0_6] : memref<1x8x16x1xf32, #tpu.memory_space<vmem>>, vector<1x8x16x1xf32>
    %3 = vector.shape_cast %2 : vector<1x8x16x1xf32> to vector<8x16x1xf32>
    %c0_7 = arith.constant 0 : index
    %c0_8 = arith.constant 0 : index
    %c0_9 = arith.constant 0 : index
    %4 = vector.load %arg4[%c0_7, %c0_8, %c0_9] : memref<3x1x128xf32, #tpu.memory_space<vmem>>, vector<1x1x128xf32>
    %c1 = arith.constant 1 : index
    %c0_10 = arith.constant 0 : index
    %c0_11 = arith.constant 0 : index
    %5 = vector.load %arg4[%c1, %c0_10, %c0_11] : memref<3x1x128xf32, #tpu.memory_space<vmem>>, vector<1x1x128xf32>
    %c2 = arith.constant 2 : index
    %c0_12 = arith.constant 0 : index
    %c0_13 = arith.constant 0 : index
    %6 = vector.load %arg4[%c2, %c0_12, %c0_13] : memref<3x1x128xf32, #tpu.memory_space<vmem>>, vector<1x1x128xf32>
    %7 = vector.broadcast %1 : vector<8x16x1xf32> to vector<8x16x128xf32>
    %8 = vector.broadcast %4 : vector<1x1x128xf32> to vector<8x16x128xf32>
    %9 = arith.mulf %7, %8 : vector<8x16x128xf32>
    %10 = vector.broadcast %3 : vector<8x16x1xf32> to vector<8x16x128xf32>
    %11 = vector.broadcast %5 : vector<1x1x128xf32> to vector<8x16x128xf32>
    %12 = arith.mulf %10, %11 : vector<8x16x128xf32>
    %13 = arith.addf %9, %12 : vector<8x16x128xf32>
    %14 = vector.broadcast %6 : vector<1x1x128xf32> to vector<8x16x128xf32>
    %15 = arith.addf %13, %14 : vector<8x16x128xf32>
    %16 = math.sin %15 : vector<8x16x128xf32>
    %c0_14 = arith.constant 0 : index
    %c0_15 = arith.constant 0 : index
    %c0_16 = arith.constant 0 : index
    %c0_17 = arith.constant 0 : index
    %17 = vector.load %arg5[%c0_14, %c0_15, %c0_16, %c0_17] : memref<1x8x16x128xf32, #tpu.memory_space<vmem>>, vector<1x8x16x128xf32>
    %18 = vector.shape_cast %17 : vector<1x8x16x128xf32> to vector<8x16x128xf32>
    %19 = vector.shape_cast %16 : vector<8x16x128xf32> to vector<1x8x16x128xf32>
    tpu.vector_store %arg5[%c0_14, %c0_15, %c0_16, %c0_17], %19 {strides = array<i32>} : memref<1x8x16x128xf32, #tpu.memory_space<vmem>>, vector<1x8x16x128xf32>,
    return
  }
  func.func @transform_0(%arg0: i32, %arg1: i32) -> (i32, i32, i32, i32) {
    %c0_i32 = arith.constant 0 : i32
    %c0_i32_0 = arith.constant 0 : i32
    %c0_i32_1 = arith.constant 0 : i32
    return %arg0, %arg1, %c0_i32, %c0_i32_0 : i32, i32, i32, i32
  }
  func.func @transform_1(%arg0: i32, %arg1: i32) -> (i32, i32, i32, i32) {
    %c0_i32 = arith.constant 0 : i32
    %c0_i32_0 = arith.constant 0 : i32
    %c0_i32_1 = arith.constant 0 : i32
    return %arg0, %arg1, %c0_i32, %c0_i32_0 : i32, i32, i32, i32
  }
  func.func @transform_2(%arg0: i32, %arg1: i32) -> (i32, i32, i32) {
    %c0_i32 = arith.constant 0 : i32
    %c0_i32_0 = arith.constant 0 : i32
    %c0_i32_1 = arith.constant 0 : i32
    %c0_i32_2 = arith.constant 0 : i32
    return %c0_i32, %c0_i32_0, %c0_i32_1 : i32, i32, i32
  }
  func.func @transform_3(%arg0: i32, %arg1: i32) -> (i32, i32, i32, i32) {
    %c0_i32 = arith.constant 0 : i32
    %c0_i32_0 = arith.constant 0 : i32
    %c0_i32_1 = arith.constant 0 : i32
    return %arg0, %arg1, %c0_i32, %c0_i32_0 : i32, i32, i32, i32
  }
}

</mosaic_0001>

<bundles_post_ra>
// kernel: tpu_custom_call.1
= control target key start
LH: loop header
LB: loop body
LE: loop exit
PB: predicated region body
PF: predicated region fallthrough
CT: control target
= control target key end

     0   :  { %8 = vsyncpa [#allocation3], 0  ;;  %s4293_s0 = inlined_call_operand.vmem [shape: f32[2,16,16,1], index: 0, kind: input, shape index: {}]   ;;  %s4294_s1 = inlined_call_operand.vmem [shape: f32[2,16,16,1], index: 1, kind: input, shape index: {}]   ;;  %s4295_s2 = inlined_call_operand.vmem [shape: f32[3,1,128], index: 2, kind: input, shape index: {}]   ;;  %s4296_s3 = inlined_call_operand.hbm [shape: f32[2,16,16,128], index: 3, kind: output, shape index: {}]  }
   0x1   :  { %10 = vsyncpa [#allocation3 + $0x1], 0  ;;  %s2753_s12 = smov 0   ;;  %s2755_s13 = smov 0  }
   0x2   :  { %s2757_s14 = smov 0   ;;  %s2759_s15 = smov 0  }
   0x3   :  { %s2761_s16 = smov 0   ;;  %s2763_s17 = smov 0  }
   0x4   :  { %s2765_s18 = smov 0   ;;  %s2767_s19 = smov 0  }
   0x5 LB: > { %s2324_s20 = sadd.s32 4294967295, %s2721_s19   ;;  %s2325_s21 = sadd.s32 4294967294, %s2721_s19   ;;  %s2721_s19 = sphi %s2767_s19, %s16_s19   ;;  %s2717_s18 = sphi %s2765_s18, %s4333_s18   ;;  %s2713_s17 = sphi %s2763_s17, %s4332_s17   ;;  %s2709_s16 = sphi %s2761_s16, %s4331_s16   ;;  %s2705_s15 = sphi %s2759_s15, %s4330_s15   ;;  %s2701_s14 = sphi %s2757_s14, %s4329_s14   ;;  %s2697_s13 = sphi %s2755_s13, %s4328_s13   ;;  %s2693_s12 = sphi %s2753_s12, %s4327_s12  }
   0x6   : > { %s25_s22 = sadd.s32 1, %s2713_s17  ;;  %s28_s23 = sadd.s32 1, %s2717_s18 }
   0x7   : > { %p26_p0 = scmp.ge.s32.totalorder %s25_s22, 2  ;;  %p124_p1 = scmp.ne.s32.totalorder %s2701_s14, %s2697_s13 }
   0x8   : > { %p125_p2 = scmp.eq.s32.totalorder %s2324_s20, 3  ;;  %p130_p5 = scmp.ne.s32.totalorder %s2697_s13, %s2693_s12 }
   0x9   : > { %s4335_s22 = smov (%p26_p0, %s25_s22), 0  ;;  %s4337_s23 = smov (!%p26_p0, %s28_s23), %s2717_s18 }
   0xa   : > { %s110_s24 = ssub.s32 %s2713_s17, %s4335_s22  ;;  %p2804_p3 = por %p125_p2, %p124_p1 }
   0xb   : > { %p30_p4 = scmp.ge.s32.totalorder %s4337_s23, 2  ;;  %p131_p6 = scmp.eq.s32.totalorder %s2325_s21, 3 }
   0xc   : > { %p2328_p7 = scmp.ge.s32.totalorder %s2721_s19, 1  ;;  %p180_p9 = scmp.lt.s32.totalorder %s2721_s19, 5 }
   0xd   : > { %s4339_s23 = smov (%p30_p4, %s4337_s23), 0  ;;  %p2813_p8 = por %p131_p6, %p130_p5 }
   0xe   : > { %s109_s27 = ssub.s32 %s2717_s18, %s4339_s23  ;;  %s114_s28 = sadd.s32 1, %s2701_s14 }
   0xf   : > { %s111_s29 = sor.u32 %s110_s24, %s109_s27  ;;  %p181_p10 = pnand %p2328_p7, %p180_p9 }
  0x10   : > { %p112_p11 = scmp.eq.s32.totalorder %s111_s29, 0  ;;  %s2330_s4 = sshll.u32 (!%p181_p10), %s2705_s15, 3 }
  0x11   : > { %184 = sbr.rel (%p181_p10) target bundleno = 646 (0x286), region = 32  ;;  %p220_p12 = scmp.lt.s32.totalorder (!%p181_p10), %s2709_s16, 1 }
  0x12   : > { %s2822_s30 = scalar_select %p112_p11, %s2701_s14, %s114_s28  }
  0x13   : > { %p222_p13 = scmp.lt.s32.totalorder (!%p181_p10), %s2330_s4, 15 }
  0x16   : > { %v2723_v0 = vmov 0   ;;  %s221_s5 = scalar_select %p220_p12, %s2709_s16, 1  ;;  %v2340_v37 = vld [vmem:[%s4295_s2] ss:$0 sm:$0xff]  ;;  %v2890_v62 = vld [vmem:[%s4295_s2 + $0x1] ss:$0 sm:$0xff] }
  0x17   : > { %2560 = vset.pattern.permute.xlu1 %v2723_v0  ;;  %2559 = vset.pattern.permute.xlu0 %v2723_v0  ;;  %s4341_s4 = smov (!%p222_p13, %s2330_s4), 15 }
  0x18   : > { %s2332_s6 = sshll.u32 %s221_s5, 5  ;;  %s2331_s7 = sshll.u32 %s4341_s4, 1 }
  0x19   : > { %s2827_s8 = sadd.s32 %s2332_s6, %s2331_s7  ;;  %s2414_s5 = sshll.u32 %s2705_s15, 4 }
  0x1a   : > { %s2333_s9 = sshll.u32 %s2827_s8, 3  ;;  %s216_s8 = sand.u32 1, %s2697_s13  }
  0x1b   : > { %s228_s20 = scalar_lea.vmem %s4293_s0, %s2333_s9  ;;  %s2840_s27 = scalar_lea.vmem %s4294_s1, %s2333_s9 }
  0x1c   : > { %v244_v1 = vld [vmem:[%s228_s20 + $0x10] sm:$0xff]  ;;  %v242_v2 = vld [vmem:[%s228_s20] sm:$0xff]  ;;  %v245_v3 = vld [vmem:[%s228_s20 + $0x18] sm:$0xff]  ;;  %s2329_s9 = sshll.u32 %s216_s8, 7  ;;  %s2410_s6 = sshll.u32 %s2709_s16, 5 }
  0x1d   : > { %291 = vperm.xlu1 %2560, %v244_v1   ;;  %281 = vperm.xlu0 %2559, %v242_v2   ;;  %v243_v4 = vld [vmem:[%s228_s20 + $0x8] sm:$0xff]  ;;  %v246_v6 = vld [vmem:[%s228_s20 + $0x20] sm:$0xff]  ;;  %v249_v7 = vld [vmem:[%s228_s20 + $0x38] sm:$0xff]  ;;  %s3196_s10 = scalar_lea.vmem [#allocation2], %s2329_s9  ;;  %s2215_s7 = sadd.s32 %s2414_s5, %s2410_s6 }
  0x1e   : > { %v247_v5 = vld [vmem:[%s228_s20 + $0x28] sm:$0xff]  ;;  %v248_v8 = vld [vmem:[%s228_s20 + $0x30] sm:$0xff]  ;;  %v250_v10 = vld [vmem:[%s228_s20 + $0x40] sm:$0xff]  ;;  %s2411_s9 = sshll.u32 %s2215_s7, 7  ;;  %s2218_s11 = sshll.u32 %s3196_s10, 4  ;;  %s4236_s11 = int_to_ptr.vmem [resolvable:$true] %s2218_s11 }
  0x1f   : > { %v251_v9 = vld [vmem:[%s228_s20 + $0x48] sm:$0xff]  ;;  %v253_v11 = vld [vmem:[%s228_s20 + $0x58] sm:$0xff]  ;;  %v252_v12 = vld [vmem:[%s228_s20 + $0x50] sm:$0xff]  ;;  %s4234_s15 = scalar_lea.hbm %s4296_s3, %s2411_s9  ;;  %s4242_s16 = scalar_lea.sflag [#allocation3], %s216_s8 }
  0x20   : > { %v255_v13 = vld [vmem:[%s228_s20 + $0x68] sm:$0xff]  ;;  %v254_v14 = vld [vmem:[%s228_s20 + $0x60] sm:$0xff]  ;;  %v257_v15 = vld [vmem:[%s228_s20 + $0x78] sm:$0xff]  ;;  %s2629_s24 = scalar_lea.vmem %s4236_s11, 2048 }
  0x21   : > { %296 = vperm.xlu1 %2560, %v245_v3   ;;  %286 = vperm.xlu0 %2559, %v243_v4   ;;  %v256_v16 = vld [vmem:[%s228_s20 + $0x70] sm:$0xff]  ;;  %v259_v17 = vld [vmem:[%s2840_s27 + $0x8] sm:$0xff]  ;;  %v258_v18 = vld [vmem:[%s2840_s27] sm:$0xff]  ;;  %p2630_p0 = scmp.ne.s32.totalorder %s4236_s11, %s2629_s24 }
  0x22   : > { %v261_v19 = vld [vmem:[%s2840_s27 + $0x18] sm:$0xff]  ;;  %v260_v20 = vld [vmem:[%s2840_s27 + $0x10] sm:$0xff]  ;;  %v263_v21 = vld [vmem:[%s2840_s27 + $0x28] sm:$0xff] }
  0x23   : > { %v262_v22 = vld [vmem:[%s2840_s27 + $0x20] sm:$0xff]  ;;  %v265_v23 = vld [vmem:[%s2840_s27 + $0x38] sm:$0xff]  ;;  %v264_v24 = vld [vmem:[%s2840_s27 + $0x30] sm:$0xff]  ;;  %p2631_p1 = pnand %p2630_p0, %p2804_p3 }
  0x24   : > { %v267_v25 = vld [vmem:[%s2840_s27 + $0x48] sm:$0xff]  ;;  %v266_v26 = vld [vmem:[%s2840_s27 + $0x40] sm:$0xff]  ;;  %v269_v27 = vld [vmem:[%s2840_s27 + $0x58] sm:$0xff] }
  0x25   : > { %306 = vperm.xlu1 %2560, %v247_v5   ;;  %301 = vperm.xlu0 %2559, %v246_v6   ;;  %v268_v28 = vld [vmem:[%s2840_s27 + $0x50] sm:$0xff]  ;;  %v271_v29 = vld [vmem:[%s2840_s27 + $0x68] sm:$0xff]  ;;  %v270_v30 = vld [vmem:[%s2840_s27 + $0x60] sm:$0xff]  ;;  %p2632_p2 = pneg %p2631_p1 }
  0x26   : > { %v273_v31 = vld [vmem:[%s2840_s27 + $0x78] sm:$0xff]  ;;  %v272_v32 = vld [vmem:[%s2840_s27 + $0x70] sm:$0xff]  ;;  %v2897_v5 = vld [vmem:[%s4295_s2 + $0x2] ss:$0 sm:$0xff]  ;;  %s2730_s27 = smov [#allocation2]  }
  0x27   : > { %s2633_s28 = sshll.u32 %s2730_s27, 4  ;;  %s2634_s28 = int_to_ptr.vmem [resolvable:$false] %s2633_s28 }
  0x28   : > { %s2635_s29 = scalar_lea.vmem %s2634_s28, 4096  ;;  %p2636_p4 = scmp.lt.s32.totalorder %s4236_s11, %s2634_s28 }
  0x29   : > { %316 = vperm.xlu1 %2560, %v249_v7   ;;  %311 = vperm.xlu0 %2559, %v248_v8   ;;  %p2637_p5 = scmp.lt.s32.totalorder %s2635_s29, %s2629_s24 }
  0x2b   : > { %p2638_p6 = por %p2637_p5, %p2636_p4 }
  0x2d   : > { %326 = vperm.xlu1 %2560, %v251_v9   ;;  %321 = vperm.xlu0 %2559, %v250_v10   ;;  %p2639_p7 = pnand %p2638_p6, %p2632_p2 }
  0x31   : > { %336 = vperm.xlu1 %2560, %v253_v11   ;;  %331 = vperm.xlu0 %2559, %v252_v12  }
  0x35   : > { %346 = vperm.xlu1 %2560, %v255_v13   ;;  %341 = vperm.xlu0 %2559, %v254_v14  }
  0x39   : > { %356 = vperm.xlu1 %2560, %v257_v15   ;;  %351 = vperm.xlu0 %2559, %v256_v16  }
  0x3d   : > { %388 = vperm.xlu1 %2560, %v259_v17   ;;  %383 = vperm.xlu0 %2559, %v258_v18  }
  0x41   : > { %398 = vperm.xlu1 %2560, %v261_v19   ;;  %393 = vperm.xlu0 %2559, %v260_v20  }
  0x45   : > { %408 = vperm.xlu1 %2560, %v263_v21   ;;  %403 = vperm.xlu0 %2559, %v262_v22  }
  0x49   : > { %418 = vperm.xlu1 %2560, %v265_v23   ;;  %413 = vperm.xlu0 %2559, %v264_v24  }
  0x4d   : > { %428 = vperm.xlu1 %2560, %v267_v25   ;;  %423 = vperm.xlu0 %2559, %v266_v26  }
  0x51   : > { %438 = vperm.xlu1 %2560, %v269_v27   ;;  %433 = vperm.xlu0 %2559, %v268_v28  }
  0x55   : > { %448 = vperm.xlu1 %2560, %v271_v29   ;;  %443 = vperm.xlu0 %2559, %v270_v30  }
  0x59   : > { %458 = vperm.xlu1 %2560, %v273_v31   ;;  %453 = vperm.xlu0 %2559, %v272_v32  }
  0x98   : > { %v2858_v33 = vpop.permute.xlu1 %291  ;;  %v282_v34 = vpop.permute.xlu0 %281 }
  0x99   : > { %v365_v1 = vmul.f32 %v2340_v37, %v282_v34  ;;  %v367_v32 = vmul.f32 %v2340_v37, %v2858_v33 }
  0x9c   : > { %v297_v35 = vpop.permute.xlu1 %296  ;;  %v287_v36 = vpop.permute.xlu0 %286 }
  0x9d   : > { %v366_v2 = vmul.f32 %v2340_v37, %v287_v36  ;;  %v368_v12 = vmul.f32 %v2340_v37, %v297_v35 }
  0xa0   : > { %v307_v38 = vpop.permute.xlu1 %306  ;;  %v302_v39 = vpop.permute.xlu0 %301 }
  0xa1   : > { %v2863_v40 = vmul.f32 %v2340_v37, %v307_v38  ;;  %v2865_v41 = vmul.f32 %v2340_v37, %v302_v39 }
  0xa4   : > { %v317_v42 = vpop.permute.xlu1 %316  ;;  %v312_v43 = vpop.permute.xlu0 %311 }
  0xa5   : > { %v2867_v44 = vmul.f32 %v2340_v37, %v317_v42  ;;  %v2869_v45 = vmul.f32 %v2340_v37, %v312_v43 }
  0xa8   : > { %v327_v46 = vpop.permute.xlu1 %326  ;;  %v322_v47 = vpop.permute.xlu0 %321 }
  0xa9   : > { %v2871_v48 = vmul.f32 %v2340_v37, %v327_v46  ;;  %v2873_v49 = vmul.f32 %v2340_v37, %v322_v47 }
  0xac   : > { %v337_v50 = vpop.permute.xlu1 %336  ;;  %v332_v51 = vpop.permute.xlu0 %331 }
  0xad   : > { %v2875_v52 = vmul.f32 %v2340_v37, %v337_v50  ;;  %v2877_v53 = vmul.f32 %v2340_v37, %v332_v51 }
  0xb0   : > { %v347_v54 = vpop.permute.xlu1 %346  ;;  %v342_v55 = vpop.permute.xlu0 %341 }
  0xb1   : > { %v2879_v56 = vmul.f32 %v2340_v37, %v347_v54  ;;  %v2881_v57 = vmul.f32 %v2340_v37, %v342_v55  ;;  %v2724_v54 = vmov 683565275  }
  0xb4   : > { %v357_v58 = vpop.permute.xlu1 %356  ;;  %v352_v59 = vpop.permute.xlu0 %351 }
  0xb5   : > { %v2883_v60 = vmul.f32 %v2340_v37, %v357_v58  ;;  %v2885_v61 = vmul.f32 %v2340_v37, %v352_v59  ;;  %v2725_v58 = vmov 2475754826  }
  0xb8   : > { %v389_v63 = vpop.permute.xlu1 %388  ;;  %v384_v0 = vpop.permute.xlu0 %383 }
  0xb9   : > { %v468_v3 = vmul.f32 %v2890_v62, %v389_v63  ;;  %v467_v4 = vmul.f32 %v2890_v62, %v384_v0  ;;  %v2726_v63 = vmov 2131351028  }
  0xbb   : > { %v484_v6 = vadd.f32 %v468_v3, %v366_v2  ;;  %v483_v7 = vadd.f32 %v467_v4, %v365_v1  ;;  %v2727_v1 = vmov 2102212464   ;;  %v2728_v3 = vmov 920167782  }
  0xbc   : > { %v399_v8 = vpop.permute.xlu1 %398  ;;  %v394_v22 = vpop.permute.xlu0 %393 }
  0xbd   : > { %v2900_v9 = vadd.f32 %v2897_v5, %v484_v6  ;;  %v2903_v10 = vadd.f32 %v2897_v5, %v483_v7  ;;  %v470_v11 = vmul.f32 %v2890_v62, %v399_v8  ;;  %v469_v27 = vmul.f32 %v2890_v62, %v394_v22 }
  0xbf   : > { %v625_v13 = vand.u32 2147483647, %v2900_v9  ;;  %v628_v14 = vand.u32 2139095040, %v2900_v9  ;;  %v521_v15 = vand.u32 2147483647, %v2903_v10  ;;  %v524_v16 = vand.u32 2139095040, %v2903_v10 }
  0xc0   : > { %v486_v18 = vadd.f32 %v470_v11, %v368_v12  ;;  %v2920_v42 = vadd.f32 %v469_v27, %v367_v32  ;;  %vm627_vm13 = vcmp.lt.s32.totalorder %v2900_v9, 0  ;;  %vm523_vm14 = vcmp.lt.s32.totalorder %v2903_v10, 0 }
  0xc1   : > { %v629_v17 = vshrl.u32 %v628_v14, 23  ;;  %v632_v19 = vand.u32 8388607, %v625_v13  ;;  %v525_v20 = vshrl.u32 %v524_v16, 23  ;;  %v528_v21 = vand.u32 8388607, %v521_v15 }
  0xc2   : > { %v2915_v24 = vadd.f32 %v2897_v5, %v486_v18  ;;  %v2729_v14 = vmov 1326507024  }
  0xc3   : > { %v2347_v23 = vadd.s32 4294967169, %v629_v17  ;;  %v2343_v25 = vadd.s32 4294967169, %v525_v20  ;;  %v633_v28 = vor.u32 8388608, %v632_v19  ;;  %v529_v29 = vor.u32 8388608, %v528_v21 }
  0xc4   : > { %v836_v31 = vand.u32 2139095040, %v2915_v24  ;;  %v833_v50 = vand.u32 2147483647, %v2915_v24 }
  0xc5   : > { %v635_v26 = vadd.s32 1, %v2347_v23  ;;  %v531_v30 = vadd.s32 1, %v2343_v25  ;;  %v2922_v43 = vshll.u32 %v633_v28, 8  ;;  %v2926_v47 = vshll.u32 %v529_v29, 8 }
  0xc6   : > { %v837_v35 = vshrl.u32 %v836_v31, 23 }
  0xc7   : > { %vm636_vm0 = vcmp.gt.s32.totalorder %v635_v26, 0  ;;  %vm532_vm1 = vcmp.gt.s32.totalorder %v531_v30, 0 }
  0xc8   : > { %v637_v34 = vsel %vm636_vm0, %v635_v26, 0  ;;  %v533_v39 = vsel %vm532_vm1, %v531_v30, 0  ;;  %v2930_v55 = vadd.s32 4294967169, %v837_v35  ;;  %vm3035_vm1 = vcmp.le.f32.partialorder %v625_v13, 0.7853982 }
  0xc9   : > { %v638_v36 = vshrl.u32 %v637_v34, 5  ;;  %v639_v38 = vand.u32 31, %v637_v34  ;;  %v2924_v46 = vshrl.u32 %v533_v39, 5  ;;  %v535_v37 = vand.u32 31, %v533_v39 }
  0xcb   : > { %v640_v51 = vsub.s32 32, %v639_v38  ;;  %v642_v33 = vshll.u32 %v2724_v54, %v639_v38  ;;  %v645_v59 = vshll.u32 %v2725_v58, %v639_v38  ;;  %v648_v0 = vshll.u32 %v2726_v63, %v639_v38 }
  0xcc   : > { %v651_v2 = vshll.u32 %v2727_v1, %v639_v38  ;;  %v654_v4 = vshll.u32 %v2728_v3, %v639_v38  ;;  %vm657_vm2 = vcmp.lt.s32.totalorder %v638_v36, 1  ;;  %vm658_vm3 = vcmp.lt.s32.totalorder %v638_v36, 2 }
  0xcd   : > { %v643_v6 = vshrl.u32 %v2725_v58, %v640_v51  ;;  %v646_v7 = vshrl.u32 %v2726_v63, %v640_v51  ;;  %v649_v8 = vshrl.u32 %v2727_v1, %v640_v51  ;;  %v641_v11 = vshrl.u32 %v2724_v54, %v640_v51 }
  0xce   : > { %v652_v12 = vshrl.u32 %v2728_v3, %v640_v51  ;;  %v655_v16 = vshrl.u32 %v2729_v14, %v640_v51  ;;  %v536_v20 = vsub.s32 32, %v535_v37  ;;  %vm659_vm4 = vcmp.lt.s32.totalorder %v638_v36, 3 }
  0xcf   : > { %v644_v17 = vor.u32 %v643_v6, %v642_v33  ;;  %v647_v18 = vor.u32 %v646_v7, %v645_v59  ;;  %v650_v19 = vor.u32 %v649_v8, %v648_v0  ;;  %vm660_vm5 = vcmp.lt.s32.totalorder %v638_v36, 4 }
  0xd0   : > { %v653_v21 = vor.u32 %v652_v12, %v651_v2  ;;  %v656_v22 = vor.u32 %v655_v16, %v654_v4  ;;  %v538_v31 = vshll.u32 %v2724_v54, %v535_v37  ;;  %v539_v35 = vshrl.u32 %v2725_v58, %v536_v20 }
  0xd1   : > { %v661_v23 = vsel %vm657_vm2, %v641_v11, %v644_v17  ;;  %v662_v25 = vsel %vm660_vm5, %v650_v19, 2102212464  ;;  %v665_v26 = vsel %vm657_vm2, %v644_v17, %v647_v18  ;;  %v669_v27 = vsel %vm657_vm2, %v647_v18, %v650_v19 }
  0xd2   : > { %v663_v28 = vsel %vm659_vm4, %v647_v18, %v662_v25  ;;  %v666_v29 = vsel %vm660_vm5, %v653_v21, 920167782  ;;  %v670_v30 = vsel %vm660_vm5, %v656_v22, 1326507024  ;;  %v541_v38 = vshll.u32 %v2725_v58, %v535_v37 }
  0xd3   : > { %v667_v32 = vsel %vm659_vm4, %v650_v19, %v666_v29  ;;  %v671_v34 = vsel %vm659_vm4, %v653_v21, %v670_v30  ;;  %v664_v39 = vsel %vm658_vm3, %v661_v23, %v663_v28  ;;  %v542_v59 = vshrl.u32 %v2726_v63, %v536_v20 }
  0xd4   : > { %v668_v51 = vsel %vm658_vm3, %v665_v26, %v667_v32  ;;  %v672_v33 = vsel %vm658_vm3, %v669_v27, %v671_v34  ;;  %v540_v7 = vor.u32 %v539_v35, %v538_v31  ;;  %v544_v11 = vshll.u32 %v2726_v63, %v535_v37 }
  0xd5   : > { %v2953_v0 = vmul.u32.u64.low %v2922_v43, %v672_v33  ;;  %v2954_v2 = vmul.u32.u64.high %v2922_v43, %v672_v33, %v2953_v0  ;;  %v2957_v4 = vmul.u32.u64.low %v2922_v43, %v668_v51  ;;  %v2958_v6 = vmul.u32.u64.high %v2922_v43, %v668_v51, %v2957_v4 }
  0xd6   : > { %v543_v8 = vor.u32 %v542_v59, %v541_v38  ;;  %v545_v12 = vshrl.u32 %v2727_v1, %v536_v20  ;;  %v537_v16 = vshrl.u32 %v2724_v54, %v536_v20  ;;  %v547_v36 = vshll.u32 %v2727_v1, %v535_v37 }
  0xd7   : > { %v548_v17 = vshrl.u32 %v2728_v3, %v536_v20  ;;  %v551_v18 = vshrl.u32 %v2729_v14, %v536_v20  ;;  %v680_v19 = vmul.u32 %v2922_v43, %v664_v39  ;;  %v550_v22 = vshll.u32 %v2728_v3, %v535_v37 }
  0xd8   : > { %v546_v21 = vor.u32 %v545_v12, %v544_v11  ;;  %vm553_vm6 = vcmp.lt.s32.totalorder %v2924_v46, 1  ;;  %vm682_vm7 = vc.u32 %v2954_v2, %v2957_v4  ;;  %v683_v23 = vadd.s32 1, %v2958_v6 }
  0xd9   : > { %v549_v25 = vor.u32 %v548_v17, %v547_v36  ;;  %vm554_vm8 = vcmp.lt.s32.totalorder %v2924_v46, 2  ;;  %v552_v26 = vor.u32 %v551_v18, %v550_v22  ;;  %vm555_vm9 = vcmp.lt.s32.totalorder %v2924_v46, 3 }
  0xda   : > { %vm556_vm10 = vcmp.lt.s32.totalorder %v2924_v46, 4  ;;  %v561_v20 = vsel %vm553_vm6, %v540_v7, %v543_v8  ;;  %v684_v43 = vsel %vm682_vm7, %v683_v23, %v2958_v6  ;;  %v565_v37 = vsel %vm553_vm6, %v543_v8, %v546_v21 }
  0xdb   : > { %v558_v27 = vsel %vm556_vm10, %v546_v21, 2102212464  ;;  %v562_v28 = vsel %vm556_vm10, %v549_v25, 920167782  ;;  %v685_v29 = vadd.s32 %v684_v43, %v680_v19  ;;  %v557_v30 = vsel %vm553_vm6, %v537_v16, %v540_v7 }
  0xdc   : > { %v563_v31 = vsel %vm555_vm9, %v546_v21, %v562_v28  ;;  %v566_v32 = vsel %vm556_vm10, %v552_v26, 1326507024  ;;  %v559_v34 = vsel %vm555_vm9, %v543_v8, %v558_v27  ;;  %v843_v39 = vadd.s32 1, %v2930_v55 }
  0xdd   : > { %v564_v35 = vsel %vm554_vm8, %v561_v20, %v563_v31  ;;  %v567_v38 = vsel %vm555_vm9, %v549_v25, %v566_v32  ;;  %v686_v51 = vadd.s32 536870912, %v685_v29  ;;  %v840_v8 = vand.u32 8388607, %v833_v50 }
  0xde   : > { %v568_v33 = vsel %vm554_vm8, %v565_v37, %v567_v38  ;;  %v2981_v59 = vmul.u32.u64.low %v2926_v47, %v564_v35  ;;  %v2982_v0 = vmul.u32.u64.high %v2926_v47, %v564_v35, %v2981_v59  ;;  %vm844_vm11 = vcmp.gt.s32.totalorder %v843_v39, 0 }
  0xdf   : > { %v2986_v6 = vmul.u32.u64.low %v2926_v47, %v568_v33  ;;  %v2987_v7 = vmul.u32.u64.high %v2926_v47, %v568_v33, %v2986_v6  ;;  %v687_v11 = vshrl.u32 %v686_v51, 30  ;;  %v560_v55 = vsel %vm554_vm8, %v557_v30, %v559_v34 }
  0xe0   : > { %v845_v12 = vsel %vm844_vm11, %v843_v39, 0  ;;  %v579_v17 = vadd.s32 1, %v2982_v0  ;;  %v2996_v18 = vadd.f32 %v2897_v5, %v2920_v42  ;;  %v576_v19 = vmul.u32 %v2926_v47, %v560_v55 }
  0xe1   : > { %v847_v16 = vand.u32 31, %v845_v12  ;;  %v688_v36 = vshll.u32 %v687_v11, 30  ;;  %vm578_vm12 = vc.u32 %v2987_v7, %v2981_v59  ;;  %v841_v21 = vor.u32 8388608, %v840_v8 }
  0xe2   : > { %v580_v46 = vsel %vm578_vm12, %v579_v17, %v2982_v0  ;;  %v681_v26 = vadd.s32 %v2957_v4, %v2954_v2  ;;  %v729_v42 = vand.u32 2147483647, %v2996_v18  ;;  %v732_v28 = vand.u32 2139095040, %v2996_v18 }
  0xe3   : > { %v848_v22 = vsub.s32 32, %v847_v16  ;;  %v3001_v23 = vsub.s32 %v685_v29, %v688_v36  ;;  %v581_v25 = vadd.s32 %v580_v46, %v576_v19  ;;  %v3009_v27 = vshll.u32 %v841_v21, 8 }
  0xe4   : > { %v3013_v29 = vshrl.u32 %v845_v12, 5  ;;  %v711_v2 = vsub.s32 4, %v687_v11  ;;  %v850_v32 = vshll.u32 %v2724_v54, %v847_v16  ;;  %v853_v38 = vshll.u32 %v2725_v58, %v847_v16 }
  0xe5   : > { %v691_v20 = vsub.s32 0, %v3001_v23  ;;  %v582_v43 = vadd.s32 536870912, %v581_v25  ;;  %v851_v47 = vshrl.u32 %v2725_v58, %v848_v22  ;;  %v854_v30 = vshrl.u32 %v2726_v63, %v848_v22 }
  0xe6   : > { %v857_v31 = vshrl.u32 %v2727_v1, %v848_v22  ;;  %v860_v34 = vshrl.u32 %v2728_v3, %v848_v22  ;;  %v856_v39 = vshll.u32 %v2726_v63, %v847_v16  ;;  %v863_v51 = vshrl.u32 %v2729_v14, %v848_v22 }
  0xe7   : > { %v2348_v37 = vmin.u32 %v691_v20, %v3001_v23  ;;  %v583_v4 = vshrl.u32 %v582_v43, 30  ;;  %v852_v0 = vor.u32 %v851_v47, %v850_v32  ;;  %v859_v6 = vshll.u32 %v2727_v1, %v847_v16 }
  0xe8   : > { %v733_v8 = vshrl.u32 %v732_v28, 23  ;;  %v855_v12 = vor.u32 %v854_v30, %v853_v38  ;;  %v858_v36 = vor.u32 %v857_v31, %v856_v39  ;;  %v862_v17 = vshll.u32 %v2728_v3, %v847_v16 }
  0xe9   : > { %v693_v35 = vclz %v2348_v37  ;;  %v584_v33 = vshll.u32 %v583_v4, 30  ;;  %v3026_v19 = vsel %vm627_vm13, %v711_v2, %v687_v11  ;;  %v849_v46 = vshrl.u32 %v2724_v54, %v848_v22 }
  0xea   : > { %v861_v20 = vor.u32 %v860_v34, %v859_v6  ;;  %v607_v43 = vsub.s32 4, %v583_v4  ;;  %v864_v47 = vor.u32 %v863_v51, %v862_v17  ;;  %vm865_vm0 = vcmp.lt.s32.totalorder %v3013_v29, 1 }
  0xeb   : > { %v2349_v55 = vadd.s32 4294967294, %v693_v35  ;;  %v3029_v21 = vsub.s32 %v581_v25, %v584_v33  ;;  %vm867_vm2 = vcmp.lt.s32.totalorder %v3013_v29, 3  ;;  %vm868_vm3 = vcmp.lt.s32.totalorder %v3013_v29, 4 }
  0xec   : > { %vm3044_vm4 = vcmp.le.f32.partialorder %v521_v15, 0.7853982  ;;  %v870_v30 = vsel %vm868_vm3, %v858_v36, 2102212464  ;;  %v873_v13 = vsel %vm865_vm0, %v852_v0, %v855_v12  ;;  %v874_v32 = vsel %vm868_vm3, %v861_v20, 920167782 }
  0xed   : > { %vm2350_vm15 = vcmp.lt.s32.totalorder %v2349_v55, 0  ;;  %v587_v28 = vsub.s32 0, %v3029_v21  ;;  %v877_v34 = vsel %vm865_vm0, %v855_v12, %v858_v36  ;;  %v875_v15 = vsel %vm867_vm2, %v858_v36, %v874_v32 }
  0xee   : > { %v696_v11 = vsel %vm2350_vm15, 0, %v2349_v55  ;;  %v878_v39 = vsel %vm868_vm3, %v864_v47, 1326507024  ;;  %vm866_vm5 = vcmp.lt.s32.totalorder %v3013_v29, 2  ;;  %v869_v33 = vsel %vm865_vm0, %v849_v46, %v852_v0 }
  0xef   : > { %v697_v22 = vsub.s32 32, %v696_v11  ;;  %v701_v25 = vsub.s32 4294967266, %v696_v11  ;;  %v698_v31 = vshll.u32 %v3001_v23, %v696_v11  ;;  %v2344_v2 = vmin.u32 %v587_v28, %v3029_v21 }
  0xf0   : > { %v871_v23 = vsel %vm867_vm2, %v855_v12, %v870_v30  ;;  %v876_v17 = vsel %vm866_vm5, %v873_v13, %v875_v15  ;;  %v577_v12 = vadd.s32 %v2981_v59, %v2987_v7  ;;  %vm717_vm12 = vweird.f32 %v2900_v9 }
  0xf1   : > { %v699_v35 = vshrl.u32 %v681_v26, %v697_v22  ;;  %v702_v38 = vadd.s32 127, %v701_v25  ;;  %v589_v51 = vclz %v2344_v2  ;;  %v879_v26 = vsel %vm867_vm2, %v861_v20, %v878_v39 }
  0xf2   : > { %v880_v28 = vsel %vm866_vm5, %v877_v34, %v879_v26  ;;  %v3064_v36 = vmul.u32.u64.low %v3009_v27, %v876_v17  ;;  %v3065_v47 = vmul.u32.u64.high %v3009_v27, %v876_v17, %v3064_v36  ;;  %v608_v25 = vsel %vm523_vm14, %v607_v43, %v583_v4 }
  0xf3   : > { %v700_v6 = vor.u32 %v699_v35, %v698_v31  ;;  %v703_v55 = vshll.u32 %v702_v38, 23  ;;  %v2345_v11 = vadd.s32 4294967294, %v589_v51  ;;  %v872_v29 = vsel %vm866_vm5, %v869_v33, %v871_v23  ;;  %v409_v23 = vpop.permute.xlu1 %408 }
  0xf4   : > { %v3070_v0 = vmul.u32.u64.low %v3009_v27, %v880_v28  ;;  %v3071_v46 = vmul.u32.u64.high %v3009_v27, %v880_v28, %v3070_v0  ;;  %v2351_v20 = vadd.s32 4294967169, %v733_v8  ;;  %v714_v31 = vsel %vm3035_vm1, 0, %v3026_v19 }
  0xf5   : > { %v704_v22 = vor.u32 4788187, %v703_v55  ;;  %vm2346_vm6 = vcmp.lt.s32.totalorder %v2345_v11, 0  ;;  %v707_v13 = vcvt.s32.f32 %v700_v6  ;;  %v610_v4 = vsel %vm3044_vm4, 0, %v608_v25  ;;  %v404_v6 = vpop.permute.xlu0 %403 }
  0xf6   : > { %v592_v2 = vsel %vm2346_vm6, 0, %v2345_v11  ;;  %v891_v43 = vadd.s32 1, %v3065_v47  ;;  %v888_v59 = vmul.u32 %v3009_v27, %v872_v29  ;;  %vm890_vm7 = vc.u32 %v3071_v46, %v3064_v36 }
  0xf7   : > { %v705_v30 = vand.u32 2147483647, %v704_v22  ;;  %v593_v32 = vsub.s32 32, %v592_v2  ;;  %v597_v34 = vsub.s32 4294967266, %v592_v2  ;;  %v739_v7 = vadd.s32 1, %v2351_v20 }
  0xf8   : > { %v594_v8 = vshll.u32 %v3029_v21, %v592_v2  ;;  %v892_v19 = vsel %vm890_vm7, %v891_v43, %v3065_v47  ;;  %v736_v33 = vand.u32 8388607, %v729_v42  ;;  %v718_v55 = vadd.s32 3, %v714_v31 }
  0xf9   : > { %v708_v35 = vmul.f32 %v707_v13, %v705_v30  ;;  %v595_v38 = vshrl.u32 %v577_v12, %v593_v32  ;;  %v598_v15 = vadd.s32 127, %v597_v34  ;;  %v893_v51 = vadd.s32 %v892_v19, %v888_v59 }
  0xfa   : > { %vm740_vm8 = vcmp.gt.s32.totalorder %v739_v7, 0  ;;  %v614_v21 = vadd.s32 3, %v610_v4  ;;  %v472_v0 = vmul.f32 %v2890_v62, %v409_v23  ;;  %v471_v12 = vmul.f32 %v2890_v62, %v404_v6 }
  0xfb   : > { %v709_v39 = vxor.u32 2147483648, %v708_v35  ;;  %v596_v17 = vor.u32 %v595_v38, %v594_v8  ;;  %v599_v27 = vshll.u32 %v598_v15, 23  ;;  %v741_v26 = vsel %vm740_vm8, %v739_v7, 0 }
  0xfc   : > { %v894_v28 = vadd.s32 536870912, %v893_v51  ;;  %v743_v22 = vand.u32 31, %v741_v26  ;;  %v3096_v31 = vand.u32 3, %v718_v55  ;;  %v3098_v2 = vand.u32 3, %v614_v21 }
  0xfd   : > { %v710_v11 = vsel %vm627_vm13, %v709_v39, %v708_v35  ;;  %v600_v25 = vor.u32 4788187, %v599_v27  ;;  %v603_v13 = vcvt.s32.f32 %v596_v17  ;;  %v737_v16 = vor.u32 8388608, %v736_v33 }
  0xfe   : > { %v713_v47 = vsel %vm3035_vm1, %v2900_v9, %v710_v11  ;;  %v3094_v29 = vshrl.u32 %v894_v28, 30  ;;  %v744_v20 = vsub.s32 32, %v743_v22  ;;  %v3102_v4 = vadd.s32 %v3064_v36, %v3071_v46 }
  0xff   : > { %2561 = vcosq.f32 %v713_v47  ;;  %v601_v30 = vand.u32 2147483647, %v600_v25  ;;  %v488_v43 = vadd.f32 %v472_v0, %v2863_v40  ;;  %v3106_v35 = vadd.f32 %v471_v12, %v2865_v41 }
 0x100   : > { %2563 = vsinq.f32 %v713_v47  ;;  %v896_v32 = vshll.u32 %v3094_v29, 30  ;;  %v750_v7 = vshrl.u32 %v2726_v63, %v744_v20  ;;  %v753_v8 = vshrl.u32 %v2727_v1, %v744_v20 }
 0x101   : > { %v604_v34 = vmul.f32 %v603_v13, %v601_v30  ;;  %v756_v38 = vshrl.u32 %v2728_v3, %v744_v20  ;;  %v3113_v19 = vshrl.u32 %v741_v26, 5  ;;  %v747_v39 = vshrl.u32 %v2725_v58, %v744_v20 }
 0x102   : > { %v3108_v59 = vsub.s32 %v893_v51, %v896_v32  ;;  %v755_v36 = vshll.u32 %v2727_v1, %v743_v22  ;;  %v746_v41 = vshll.u32 %v2724_v54, %v743_v22  ;;  %v749_v46 = vshll.u32 %v2725_v58, %v743_v22 }
 0x103   : > { %v605_v15 = vxor.u32 2147483648, %v604_v34  ;;  %v752_v51 = vshll.u32 %v2726_v63, %v743_v22  ;;  %vm724_vm9 = vcmp.eq.s32.totalorder %v3096_v31, 2  ;;  %v758_v6 = vshll.u32 %v2728_v3, %v743_v22 }
 0x104   : > { %v899_v40 = vsub.s32 0, %v3108_v59  ;;  %v757_v23 = vor.u32 %v756_v38, %v755_v36  ;;  %v759_v55 = vshrl.u32 %v2729_v14, %v744_v20  ;;  %vm721_vm10 = vcmp.eq.s32.totalorder %v3096_v31, 0 }
 0x105   : > { %v606_v33 = vsel %vm523_vm14, %v605_v15, %v604_v34  ;;  %v751_v26 = vor.u32 %v750_v7, %v749_v46  ;;  %v754_v11 = vor.u32 %v753_v8, %v752_v51  ;;  %vm720_vm11 = vcmp.lt.s32.totalorder %v3096_v31, 2 }
 0x106   : > { %v609_v17 = vsel %vm3044_vm4, %v2903_v10, %v606_v33  ;;  %v2356_v27 = vmin.u32 %v899_v40, %v3108_v59  ;;  %v748_v21 = vor.u32 %v747_v39, %v746_v41  ;;  %v760_v28 = vor.u32 %v759_v55, %v758_v6 }
 0x107   : > { %2565 = vcosq.f32 %v609_v17  ;;  %v3132_v47 = vshll.u32 %v737_v16, 8  ;;  %vm764_vm13 = vcmp.lt.s32.totalorder %v3113_v19, 4  ;;  %v3137_v37 = vadd.f32 %v2897_v5, %v488_v43 }
 0x108   : > { %2567 = vsinq.f32 %v609_v17  ;;  %v901_v22 = vclz %v2356_v27  ;;  %vm835_vm14 = vcmp.lt.s32.totalorder %v2915_v24, 0  ;;  %v919_v25 = vsub.s32 4, %v3094_v29 }
 0x109   : > { %v745_v0 = vshrl.u32 %v2724_v54, %v744_v20  ;;  %vm761_vm15 = vcmp.lt.s32.totalorder %v3113_v19, 1  ;;  %v770_v12 = vsel %vm764_vm13, %v757_v23, 920167782  ;;  %vm763_vm0 = vcmp.lt.s32.totalorder %v3113_v19, 3 }
 0x10a   : > { %v2357_v30 = vadd.s32 4294967294, %v901_v22  ;;  %v766_v13 = vsel %vm764_vm13, %v754_v11, 2102212464  ;;  %v773_v32 = vsel %vm761_vm15, %v751_v26, %v754_v11  ;;  %vm762_vm1 = vcmp.lt.s32.totalorder %v3113_v19, 2 }
 0x10b   : > { %v769_v20 = vsel %vm761_vm15, %v748_v21, %v751_v26  ;;  %v771_v34 = vsel %vm763_vm0, %v754_v11, %v770_v12  ;;  %v774_v43 = vsel %vm764_vm13, %v760_v28, 1326507024  ;;  %vm3162_vm2 = vcmp.le.f32.partialorder %v833_v50, 0.7853982 }
 0x10c   : > { %v2562_v16 = vpop.eup %2561  ;;  %vm2358_vm3 = vcmp.lt.s32.totalorder %v2357_v30, 0  ;;  %v765_v15 = vsel %vm761_vm15, %v745_v0, %v748_v21  ;;  %v775_v39 = vsel %vm763_vm0, %v757_v23, %v774_v43  ;;  %v767_v41 = vsel %vm763_vm0, %v751_v26, %v766_v13 }
 0x10d   : > { %v2564_v7 = vpop.eup %2563  ;;  %v725_v8 = vxor.u32 2147483648, %v2562_v16  ;;  %v904_v40 = vsel %vm2358_vm3, 0, %v2357_v30  ;;  %v776_v46 = vsel %vm762_vm1, %v773_v32, %v775_v39  ;;  %v772_v6 = vsel %vm762_vm1, %v769_v20, %v771_v34 }
 0x10e   : > { %v722_v36 = vxor.u32 2147483648, %v2564_v7  ;;  %v905_v51 = vsub.s32 32, %v904_v40  ;;  %v909_v33 = vsub.s32 4294967266, %v904_v40  ;;  %v1044_v27 = vand.u32 2139095040, %v3137_v37 }
 0x10f   : > { %v726_v50 = vsel %vm724_vm9, %v725_v8, %v2564_v7  ;;  %v3181_v23 = vmul.u32.u64.low %v3132_v47, %v776_v46  ;;  %v3182_v17 = vmul.u32.u64.high %v3132_v47, %v776_v46, %v3181_v23  ;;  %v906_v11 = vshll.u32 %v3108_v59, %v904_v40 }
 0x110   : > { %v723_v55 = vsel %vm721_vm10, %v2562_v16, %v722_v36  ;;  %v907_v21 = vshrl.u32 %v3102_v4, %v905_v51  ;;  %v910_v28 = vadd.s32 127, %v909_v33  ;;  %v1045_v30 = vshrl.u32 %v1044_v27, 23 }
 0x111   : > { %v727_v26 = vsel %vm720_vm11, %v723_v55, %v726_v50  ;;  %v3192_v0 = vmul.u32.u64.low %v3132_v47, %v772_v6  ;;  %v3193_v12 = vmul.u32.u64.high %v3132_v47, %v772_v6, %v3192_v0  ;;  %vm616_vm4 = vcmp.lt.s32.totalorder %v3098_v2, 2 }
 0x112   : > { %v728_v22 = vsel %vm717_vm12, nan, %v727_v26  ;;  %v908_v31 = vor.u32 %v907_v21, %v906_v11  ;;  %v911_v59 = vshll.u32 %v910_v28, 23  ;;  %v920_v4 = vsel %vm835_vm14, %v919_v25, %v3094_v29 }
 0x113   : > { %2186 = vst [vmem:[%s3196_s10 + $0x8] sm:$0xff] %v728_v22  ;;  %vm617_vm5 = vcmp.eq.s32.totalorder %v3098_v2, 0  ;;  %v768_v9 = vsel %vm762_vm1, %v765_v15, %v767_v41  ;;  %v1041_v13 = vand.u32 2147483647, %v3137_v37  ;;  %v2363_v32 = vadd.s32 4294967169, %v1045_v30 }
 0x114   : > { %v2566_v16 = vpop.eup %2565  ;;  %vm620_vm6 = vcmp.eq.s32.totalorder %v3098_v2, 2  ;;  %v912_v20 = vor.u32 4788187, %v911_v59  ;;  %vm786_vm7 = vc.u32 %v3182_v17, %v3192_v0  ;;  %v3212_v34 = vadd.f32 %v2897_v5, %v3106_v35 }
 0x115   : > { %v2568_v29 = vpop.eup %2567  ;;  %v621_v25 = vxor.u32 2147483648, %v2566_v16  ;;  %v922_v19 = vsel %vm3162_vm2, 0, %v920_v4  ;;  %v787_v43 = vadd.s32 1, %v3193_v12  ;;  %v1051_v7 = vadd.s32 1, %v2363_v32 }
 0x116   : > { %v618_v8 = vxor.u32 2147483648, %v2568_v29  ;;  %v913_v15 = vand.u32 2147483647, %v912_v20  ;;  %v915_v39 = vcvt.s32.f32 %v908_v31  ;;  %v784_v36 = vmul.u32 %v3132_v47, %v768_v9 }
 0x117   : > { %v622_v40 = vsel %vm620_vm6, %v621_v25, %v2568_v29  ;;  %v788_v41 = vsel %vm786_vm7, %v787_v43, %v3193_v12  ;;  %v1048_v5 = vand.u32 8388607, %v1041_v13  ;;  %vm1052_vm8 = vcmp.gt.s32.totalorder %v1051_v7, 0 }
 0x118   : > { %v619_v35 = vsel %vm617_vm5, %v2566_v16, %v618_v8  ;;  %v916_v46 = vmul.f32 %v915_v39, %v913_v15  ;;  %v789_v50 = vadd.s32 %v788_v41, %v784_v36  ;;  %v1053_v51 = vsel %vm1052_vm8, %v1051_v7, 0 }
 0x119   : > { %vm613_vm9 = vweird.f32 %v2903_v10  ;;  %v623_v33 = vsel %vm616_vm4, %v619_v35, %v622_v40  ;;  %v1055_v47 = vand.u32 31, %v1053_v51  ;;  %v926_v23 = vadd.s32 3, %v922_v19 }
 0x11a   : > { %v624_v6 = vsel %vm613_vm9, nan, %v623_v33  ;;  %v917_v55 = vxor.u32 2147483648, %v916_v46  ;;  %v790_v27 = vadd.s32 536870912, %v789_v50  ;;  %v1049_v26 = vor.u32 8388608, %v1048_v5 }
 0x11b   : > { %2185 = vst [vmem:[%s3196_s10] sm:$0xff] %v624_v6  ;;  %v1054_v11 = vshrl.u32 %v1053_v51, 5  ;;  %v1056_v21 = vsub.s32 32, %v1055_v47  ;;  %v940_v28 = vand.u32 2139095040, %v3212_v34  ;;  %v1058_v10 = vshll.u32 %v2724_v54, %v1055_v47 }
 0x11c   : > { %v918_v22 = vsel %vm835_vm14, %v917_v55, %v916_v46  ;;  %v3230_v12 = vshrl.u32 %v790_v27, 30  ;;  %v1061_v2 = vshll.u32 %v2725_v58, %v1055_v47  ;;  %v1064_v4 = vshll.u32 %v2726_v63, %v1055_v47 }
 0x11d   : > { %v921_v30 = vsel %vm3162_vm2, %v2915_v24, %v918_v22  ;;  %v1059_v31 = vshrl.u32 %v2725_v58, %v1056_v21  ;;  %v1062_v59 = vshrl.u32 %v2726_v63, %v1056_v21  ;;  %v1065_v32 = vshrl.u32 %v2727_v1, %v1056_v21 }
 0x11e   : > { %2569 = vcosq.f32 %v921_v30  ;;  %v792_v9 = vshll.u32 %v3230_v12, 30  ;;  %v1067_v16 = vshll.u32 %v2727_v1, %v1055_v47  ;;  %v1068_v29 = vshrl.u32 %v2728_v3, %v1056_v21 }
 0x11f   : > { %2571 = vsinq.f32 %v921_v30  ;;  %v1060_v20 = vor.u32 %v1059_v31, %v1058_v10  ;;  %v1070_v38 = vshll.u32 %v2728_v3, %v1055_v47  ;;  %v1063_v19 = vor.u32 %v1062_v59, %v1061_v2 }
 0x120   : > { %v3245_v25 = vsub.s32 %v789_v50, %v792_v9  ;;  %v1066_v43 = vor.u32 %v1065_v32, %v1064_v4  ;;  %v1071_v7 = vshrl.u32 %v2729_v14, %v1056_v21  ;;  %v1069_v8 = vor.u32 %v1068_v29, %v1067_v16 }
 0x121   : > { %v941_v15 = vshrl.u32 %v940_v28, 23  ;;  %v3248_v39 = vand.u32 3, %v926_v23  ;;  %v3251_v41 = vshll.u32 %v1049_v26, 8  ;;  %v1057_v5 = vshrl.u32 %v2724_v54, %v1056_v21 }
 0x122   : > { %v795_v36 = vsub.s32 0, %v3245_v25  ;;  %v1072_v40 = vor.u32 %v1071_v7, %v1070_v38  ;;  %vm1073_vm10 = vcmp.lt.s32.totalorder %v1054_v11, 1  ;;  %vm1075_vm11 = vcmp.lt.s32.totalorder %v1054_v11, 3 }
 0x123   : > { %vm1076_vm12 = vcmp.lt.s32.totalorder %v1054_v11, 4  ;;  %v1081_v50 = vsel %vm1073_vm10, %v1060_v20, %v1063_v19  ;;  %v1085_v47 = vsel %vm1073_vm10, %v1063_v19, %v1066_v43  ;;  %v2359_v55 = vadd.s32 4294967169, %v941_v15 }
 0x124   : > { %v2352_v35 = vmin.u32 %v795_v36, %v3245_v25  ;;  %v1078_v46 = vsel %vm1076_vm12, %v1066_v43, 2102212464  ;;  %v1082_v51 = vsel %vm1076_vm12, %v1069_v8, 920167782  ;;  %v1086_v6 = vsel %vm1076_vm12, %v1072_v40, 1326507024 }
 0x125   : > { %v1083_v33 = vsel %vm1075_vm11, %v1066_v43, %v1082_v51  ;;  %vm929_vm13 = vcmp.eq.s32.totalorder %v3248_v39, 0  ;;  %vm1074_vm14 = vcmp.lt.s32.totalorder %v1054_v11, 2  ;;  %v1077_v27 = vsel %vm1073_vm10, %v1057_v5, %v1060_v20 }
 0x126   : > { %v797_v23 = vclz %v2352_v35  ;;  %v1079_v26 = vsel %vm1075_vm11, %v1063_v19, %v1078_v46  ;;  %v1084_v21 = vsel %vm1074_vm14, %v1081_v50, %v1083_v33  ;;  %v1087_v28 = vsel %vm1075_vm11, %v1069_v8, %v1086_v6 }
 0x127   : > { %v937_v22 = vand.u32 2147483647, %v3212_v34  ;;  %v947_v10 = vadd.s32 1, %v2359_v55  ;;  %vm925_vm15 = vweird.f32 %v2915_v24  ;;  %vm731_vm0 = vcmp.lt.s32.totalorder %v2996_v18, 0 }
 0x128   : > { %v2353_v2 = vadd.s32 4294967294, %v797_v23  ;;  %v1088_v30 = vsel %vm1074_vm14, %v1085_v47, %v1087_v28  ;;  %v3263_v31 = vmul.u32.u64.low %v3251_v41, %v1084_v21  ;;  %v3264_v59 = vmul.u32.u64.high %v3251_v41, %v1084_v21, %v3263_v31 }
 0x129   : > { %v1080_v4 = vsel %vm1074_vm14, %v1077_v27, %v1079_v26  ;;  %v3268_v9 = vmul.u32.u64.low %v3251_v41, %v1088_v30  ;;  %v3269_v32 = vmul.u32.u64.high %v3251_v41, %v1088_v30, %v3268_v9  ;;  %vm948_vm1 = vcmp.gt.s32.totalorder %v947_v10, 0 }
 0x12a   : > { %vm932_vm2 = vcmp.eq.s32.totalorder %v3248_v39, 2  ;;  %v785_v11 = vadd.s32 %v3192_v0, %v3182_v17  ;;  %vm2354_vm3 = vcmp.lt.s32.totalorder %v2353_v2, 0  ;;  %v949_v16 = vsel %vm948_vm1, %v947_v10, 0 }
 0x12b   : > { %v2570_v20 = vpop.eup %2569  ;;  %v800_v29 = vsel %vm2354_vm3, 0, %v2353_v2  ;;  %v815_v38 = vsub.s32 4, %v3230_v12  ;;  %v944_v19 = vand.u32 8388607, %v937_v22  ;;  %v951_v43 = vand.u32 31, %v949_v16 }
 0x12c   : > { %v2572_v7 = vpop.eup %2571  ;;  %v933_v8 = vxor.u32 2147483648, %v2570_v20  ;;  %v801_v15 = vsub.s32 32, %v800_v29  ;;  %v805_v36 = vsub.s32 4294967266, %v800_v29  ;;  %v1096_v40 = vmul.u32 %v3251_v41, %v1080_v4 }
 0x12d   : > { %v930_v5 = vxor.u32 2147483648, %v2572_v7  ;;  %vm3280_vm4 = vcmp.le.f32.partialorder %v729_v42, 0.7853982  ;;  %v802_v0 = vshll.u32 %v3245_v25, %v800_v29  ;;  %vm1098_vm5 = vc.u32 %v3269_v32, %v3263_v31 }
 0x12e   : > { %v1099_v35 = vadd.s32 1, %v3264_v59  ;;  %v934_v46 = vsel %vm932_vm2, %v933_v8, %v2572_v7  ;;  %v803_v50 = vshrl.u32 %v785_v11, %v801_v15  ;;  %v806_v41 = vadd.s32 127, %v805_v36 }
 0x12f   : > { %v952_v51 = vsub.s32 32, %v951_v43  ;;  %vm928_vm6 = vcmp.lt.s32.totalorder %v3248_v39, 2  ;;  %v931_v42 = vsel %vm929_vm13, %v2570_v20, %v930_v5  ;;  %v945_v25 = vor.u32 8388608, %v944_v19 }
 0x130   : > { %v1100_v33 = vsel %vm1098_vm5, %v1099_v35, %v3264_v59  ;;  %v935_v47 = vsel %vm928_vm6, %v931_v42, %v934_v46  ;;  %v804_v6 = vor.u32 %v803_v50, %v802_v0  ;;  %v807_v55 = vshll.u32 %v806_v41, 23  ;;  %v414_v0 = vpop.permute.xlu0 %413 }
 0x131   : > { %v1101_v23 = vadd.s32 %v1100_v33, %v1096_v40  ;;  %v936_v27 = vsel %vm925_vm15, nan, %v935_v47  ;;  %v816_v26 = vsel %vm731_vm0, %v815_v38, %v3230_v12  ;;  %v955_v21 = vshrl.u32 %v2725_v58, %v952_v51  ;;  %v419_v38 = vpop.permute.xlu1 %418 }
 0x132   : > { %v958_v28 = vshrl.u32 %v2726_v63, %v952_v51  ;;  %2188 = vst [vmem:[%s3196_s10 + $0x18] sm:$0xff] %v936_v27  ;;  %v808_v39 = vor.u32 4788187, %v807_v55  ;;  %v3302_v2 = vshrl.u32 %v949_v16, 5  ;;  %v954_v30 = vshll.u32 %v2724_v54, %v951_v43 }
 0x133   : > { %v1102_v10 = vadd.s32 536870912, %v1101_v23  ;;  %v811_v59 = vcvt.s32.f32 %v804_v6  ;;  %v957_v4 = vshll.u32 %v2725_v58, %v951_v43  ;;  %v960_v24 = vshll.u32 %v2726_v63, %v951_v43 }
 0x134   : > { %v961_v9 = vshrl.u32 %v2727_v1, %v952_v51  ;;  %v809_v11 = vand.u32 2147483647, %v808_v39  ;;  %v963_v20 = vshll.u32 %v2727_v1, %v951_v43  ;;  %v964_v29 = vshrl.u32 %v2728_v3, %v952_v51 }
 0x135   : > { %v3308_v12 = vshrl.u32 %v1102_v10, 30  ;;  %v956_v19 = vor.u32 %v955_v21, %v954_v30  ;;  %v959_v16 = vor.u32 %v958_v28, %v957_v4  ;;  %v966_v7 = vshll.u32 %v2728_v3, %v951_v43 }
 0x136   : > { %v967_v8 = vshrl.u32 %v2729_v14, %v952_v51  ;;  %v812_v15 = vmul.f32 %v811_v59, %v809_v11  ;;  %v818_v36 = vsel %vm3280_vm4, 0, %v816_v26  ;;  %v965_v5 = vor.u32 %v964_v29, %v963_v20 }
 0x137   : > { %v1104_v40 = vshll.u32 %v3308_v12, 30  ;;  %v962_v35 = vor.u32 %v961_v9, %v960_v24  ;;  %v3317_v50 = vshll.u32 %v945_v25, 8  ;;  %v474_v41 = vmul.f32 %v2890_v62, %v419_v38  ;;  %v3330_v25 = vld [vmem:[%s4295_s2 + $0x1] ss:$0 sm:$0xff] }
 0x138   : > { %v968_v46 = vor.u32 %v967_v8, %v966_v7  ;;  %v813_v42 = vxor.u32 2147483648, %v812_v15  ;;  %vm969_vm7 = vcmp.lt.s32.totalorder %v3302_v2, 1  ;;  %vm972_vm8 = vcmp.lt.s32.totalorder %v3302_v2, 4 }
 0x139   : > { %v3320_v33 = vsub.s32 %v1101_v23, %v1104_v40  ;;  %v953_v43 = vshrl.u32 %v2724_v54, %v952_v51  ;;  %v977_v47 = vsel %vm969_vm7, %v956_v19, %v959_v16  ;;  %v978_v6 = vsel %vm972_vm8, %v965_v5, 920167782 }
 0x13a   : > { %v473_v62 = vmul.f32 %v3330_v25, %v414_v0  ;;  %v814_v55 = vsel %vm731_vm0, %v813_v42, %v812_v15  ;;  %vm970_vm9 = vcmp.lt.s32.totalorder %v3302_v2, 2  ;;  %vm971_vm10 = vcmp.lt.s32.totalorder %v3302_v2, 3 }
 0x13b   : > { %v1107_v23 = vsub.s32 0, %v3320_v33  ;;  %v817_v51 = vsel %vm3280_vm4, %v2996_v18, %v814_v55  ;;  %v974_v27 = vsel %vm972_vm8, %v962_v35, 2102212464  ;;  %v979_v26 = vsel %vm971_vm10, %v962_v35, %v978_v6 }
 0x13c   : > { %v982_v21 = vsel %vm972_vm8, %v968_v46, 1326507024  ;;  %2573 = vcosq.f32 %v817_v51  ;;  %v980_v39 = vsel %vm970_vm9, %v977_v47, %v979_v26  ;;  %v981_v10 = vsel %vm969_vm7, %v959_v16, %v962_v35 }
 0x13d   : > { %v2364_v28 = vmin.u32 %v1107_v23, %v3320_v33  ;;  %2575 = vsinq.f32 %v817_v51  ;;  %v983_v30 = vsel %vm971_vm10, %v965_v5, %v982_v21  ;;  %v822_v17 = vadd.s32 3, %v818_v36 }
 0x13e   : > { %v3347_v59 = vmul.u32.u64.low %v3317_v50, %v980_v39  ;;  %v3348_v4 = vmul.u32.u64.high %v3317_v50, %v980_v39, %v3347_v59  ;;  %v973_v9 = vsel %vm969_vm7, %v953_v43, %v956_v19  ;;  %v975_v11 = vsel %vm971_vm10, %v959_v16, %v974_v27  ;;  %v3370_v19 = vld [vmem:[%s4295_s2 + $0x2] ss:$0 sm:$0xff] }
 0x13f   : > { %v1109_v24 = vclz %v2364_v28  ;;  %v984_v20 = vsel %vm970_vm9, %v981_v10, %v983_v30  ;;  %v490_v29 = vadd.f32 %v474_v41, %v2867_v44  ;;  %v1127_v7 = vsub.s32 4, %v3308_v12 }
 0x140   : > { %v3358_v8 = vmul.u32.u64.low %v3317_v50, %v984_v20  ;;  %v3359_v15 = vmul.u32.u64.high %v3317_v50, %v984_v20, %v3358_v8  ;;  %vm3363_vm11 = vcmp.le.f32.partialorder %v1041_v13, 0.7853982  ;;  %v489_v16 = vadd.f32 %v473_v62, %v2869_v45 }
 0x141   : > { %v2365_v38 = vadd.s32 4294967294, %v1109_v24  ;;  %v3373_v44 = vadd.f32 %v3370_v19, %v490_v29  ;;  %vm1043_vm12 = vcmp.lt.s32.totalorder %v3137_v37, 0  ;;  %v976_v40 = vsel %vm970_vm9, %v973_v9, %v975_v11  ;;  %v429_v8 = vpop.permute.xlu1 %428 }
 0x142   : > { %v995_v13 = vadd.s32 1, %v3348_v4  ;;  %v823_v5 = vand.u32 3, %v822_v17  ;;  %v1097_v41 = vadd.s32 %v3263_v31, %v3269_v32  ;;  %v1128_v45 = vsel %vm1043_vm12, %v1127_v7, %v3308_v12 }
 0x143   : > { %vm2366_vm13 = vcmp.lt.s32.totalorder %v2365_v38, 0  ;;  %v1249_v35 = vand.u32 2147483647, %v3373_v44  ;;  %v1252_v46 = vand.u32 2139095040, %v3373_v44  ;;  %v992_v2 = vmul.u32 %v3317_v50, %v976_v40 }
 0x144   : > { %v1112_v0 = vsel %vm2366_vm13, 0, %v2365_v38  ;;  %vm994_vm14 = vc.u32 %v3359_v15, %v3347_v59  ;;  %v3391_v6 = vadd.f32 %v3370_v19, %v489_v16  ;;  %v1130_v32 = vsel %vm3363_vm11, 0, %v1128_v45 }
 0x145   : > { %v1113_v42 = vsub.s32 32, %v1112_v0  ;;  %v1117_v43 = vsub.s32 4294967266, %v1112_v0  ;;  %v1253_v47 = vshrl.u32 %v1252_v46, 23  ;;  %v1114_v62 = vshll.u32 %v3320_v33, %v1112_v0 }
 0x146   : > { %v996_v31 = vsel %vm994_vm14, %v995_v13, %v3348_v4  ;;  %v1256_v50 = vand.u32 8388607, %v1249_v35  ;;  %vm821_vm15 = vweird.f32 %v2996_v18  ;;  %vm824_vm0 = vcmp.lt.s32.totalorder %v823_v5, 2 }
 0x147   : > { %v1115_v55 = vshrl.u32 %v1097_v41, %v1113_v42  ;;  %v1118_v23 = vadd.s32 127, %v1117_v43  ;;  %v997_v51 = vadd.s32 %v996_v31, %v992_v2  ;;  %v2371_v12 = vadd.s32 4294967169, %v1253_v47 }
 0x148   : > { %vm825_vm1 = vcmp.eq.s32.totalorder %v823_v5, 0  ;;  %v1148_v39 = vand.u32 2139095040, %v3391_v6  ;;  %vm828_vm2 = vcmp.eq.s32.totalorder %v823_v5, 2  ;;  %v1134_v17 = vadd.s32 3, %v1130_v32 }
 0x149   : > { %v1116_v27 = vor.u32 %v1115_v55, %v1114_v62  ;;  %v1119_v26 = vshll.u32 %v1118_v23, 23  ;;  %v2574_v21 = vpop.eup %2573  ;;  %v998_v33 = vadd.s32 536870912, %v997_v51  ;;  %v1259_v28 = vadd.s32 1, %v2371_v12 }
 0x14a   : > { %v2576_v10 = vpop.eup %2575  ;;  %v829_v30 = vxor.u32 2147483648, %v2574_v21  ;;  %vm939_vm3 = vcmp.lt.s32.totalorder %v3212_v34, 0  ;;  %v1257_v11 = vor.u32 8388608, %v1256_v50  ;;  %v1145_v13 = vand.u32 2147483647, %v3391_v6 }
 0x14b   : > { %v1120_v4 = vor.u32 4788187, %v1119_v26  ;;  %v826_v24 = vxor.u32 2147483648, %v2576_v10  ;;  %v999_v9 = vshrl.u32 %v998_v33, 30  ;;  %vm1260_vm4 = vcmp.gt.s32.totalorder %v1259_v28, 0 }
 0x14c   : > { %v830_v20 = vsel %vm828_vm2, %v829_v30, %v2576_v10  ;;  %v1123_v38 = vcvt.s32.f32 %v1116_v27  ;;  %v1261_v7 = vsel %vm1260_vm4, %v1259_v28, 0  ;;  %v1149_v0 = vshrl.u32 %v1148_v39, 23 }
 0x14d   : > { %v1121_v29 = vand.u32 2147483647, %v1120_v4  ;;  %v827_v16 = vsel %vm825_vm1, %v2574_v21, %v826_v24  ;;  %v1000_v40 = vshll.u32 %v999_v9, 30  ;;  %v3405_v42 = vand.u32 3, %v1134_v17 }
 0x14e   : > { %v831_v46 = vsel %vm824_vm0, %v827_v16, %v830_v20  ;;  %v1263_v43 = vand.u32 31, %v1261_v7  ;;  %v993_v2 = vadd.s32 %v3347_v59, %v3359_v15  ;;  %v3414_v62 = vmul.f32 %v3330_v25, %v429_v8 }
 0x14f   : > { %v1124_v41 = vmul.f32 %v1123_v38, %v1121_v29  ;;  %v832_v45 = vsel %vm821_vm15, nan, %v831_v46  ;;  %v3411_v47 = vsub.s32 %v997_v51, %v1000_v40  ;;  %v1023_v23 = vsub.s32 4, %v999_v9 }
 0x150   : > { %2187 = vst [vmem:[%s3196_s10 + $0x10] sm:$0xff] %v832_v45  ;;  %v1264_v5 = vsub.s32 32, %v1263_v43  ;;  %v3417_v31 = vshll.u32 %v1257_v11, 8  ;;  %v1262_v12 = vshrl.u32 %v1261_v7, 5  ;;  %v2367_v50 = vadd.s32 4294967169, %v1149_v0 }
 0x151   : > { %v1125_v55 = vxor.u32 2147483648, %v1124_v41  ;;  %v1003_v32 = vsub.s32 0, %v3411_v47  ;;  %v3422_v18 = vand.u32 8388607, %v1145_v13  ;;  %v1266_v15 = vshll.u32 %v2724_v54, %v1263_v43 }
 0x152   : > { %v1267_v51 = vshrl.u32 %v2725_v58, %v1264_v5  ;;  %v1270_v27 = vshrl.u32 %v2726_v63, %v1264_v5  ;;  %v1269_v33 = vshll.u32 %v2725_v58, %v1263_v43  ;;  %v1273_v28 = vshrl.u32 %v2727_v1, %v1264_v5 }
 0x153   : > { %v1126_v59 = vsel %vm1043_vm12, %v1125_v55, %v1124_v41  ;;  %v2360_v21 = vmin.u32 %v1003_v32, %v3411_v47  ;;  %v3437_v39 = vsel %vm939_vm3, %v1023_v23, %v999_v9  ;;  %v1272_v30 = vshll.u32 %v2726_v63, %v1263_v43 }
 0x154   : > { %v1129_v26 = vsel %vm3363_vm11, %v3137_v37, %v1126_v59  ;;  %v1268_v10 = vor.u32 %v1267_v51, %v1266_v15  ;;  %v1271_v17 = vor.u32 %v1270_v27, %v1269_v33  ;;  %vm1281_vm5 = vcmp.lt.s32.totalorder %v1262_v12, 1 }
 0x155   : > { %2577 = vcosq.f32 %v1129_v26  ;;  %v1005_v4 = vclz %v2360_v21  ;;  %v1265_v36 = vshrl.u32 %v2724_v54, %v1264_v5  ;;  %v1274_v24 = vor.u32 %v1273_v28, %v1272_v30 }
 0x156   : > { %2579 = vsinq.f32 %v1129_v26  ;;  %v1275_v11 = vshll.u32 %v2727_v1, %v1263_v43  ;;  %v1276_v20 = vshrl.u32 %v2728_v3, %v1264_v5  ;;  %v1278_v38 = vshll.u32 %v2728_v3, %v1263_v43 }
 0x157   : > { %v2361_v29 = vadd.s32 4294967294, %v1005_v4  ;;  %v1279_v9 = vshrl.u32 %v2729_v14, %v1264_v5  ;;  %vm1282_vm6 = vcmp.lt.s32.totalorder %v1262_v12, 2  ;;  %vm3447_vm7 = vcmp.le.f32.partialorder %v937_v22, 0.7853982 }
 0x158   : > { %v1277_v8 = vor.u32 %v1276_v20, %v1275_v11  ;;  %vm1283_vm8 = vcmp.lt.s32.totalorder %v1262_v12, 3  ;;  %vm1284_vm9 = vcmp.lt.s32.totalorder %v1262_v12, 4  ;;  %v1285_v16 = vsel %vm1281_vm5, %v1265_v36, %v1268_v10 }
 0x159   : > { %vm2362_vm10 = vcmp.lt.s32.totalorder %v2361_v29, 0  ;;  %v1280_v40 = vor.u32 %v1279_v9, %v1278_v38  ;;  %v1286_v0 = vsel %vm1284_vm9, %v1274_v24, 2102212464  ;;  %v1289_v46 = vsel %vm1281_vm5, %v1268_v10, %v1271_v17 }
 0x15a   : > { %v1008_v41 = vsel %vm2362_vm10, 0, %v2361_v29  ;;  %v1287_v43 = vsel %vm1283_vm8, %v1271_v17, %v1286_v0  ;;  %v1290_v45 = vsel %vm1284_vm9, %v1277_v8, 920167782  ;;  %v1155_v22 = vadd.s32 1, %v2367_v50 }
 0x15b   : > { %v1009_v55 = vsub.s32 32, %v1008_v41  ;;  %v1010_v23 = vshll.u32 %v3411_v47, %v1008_v41  ;;  %v1013_v5 = vsub.s32 4294967266, %v1008_v41  ;;  %v1293_v32 = vsel %vm1281_vm5, %v1271_v17, %v1274_v24 }
 0x15c   : > { %v1288_v59 = vsel %vm1282_vm6, %v1285_v16, %v1287_v43  ;;  %v1291_v15 = vsel %vm1283_vm8, %v1274_v24, %v1290_v45  ;;  %v1294_v51 = vsel %vm1284_vm9, %v1280_v40, 1326507024  ;;  %vm1156_vm11 = vcmp.gt.s32.totalorder %v1155_v22, 0 }
 0x15d   : > { %v1011_v27 = vshrl.u32 %v993_v2, %v1009_v55  ;;  %v1014_v26 = vadd.s32 127, %v1013_v5  ;;  %v1292_v21 = vsel %vm1282_vm6, %v1289_v46, %v1291_v15  ;;  %v1295_v33 = vsel %vm1283_vm8, %v1277_v8, %v1294_v51 }
 0x15e   : > { %vm1133_vm12 = vweird.f32 %v3137_v37  ;;  %v1296_v47 = vsel %vm1282_vm6, %v1293_v32, %v1295_v33  ;;  %v3466_v50 = vmul.u32.u64.low %v3417_v31, %v1292_v21  ;;  %v3467_v28 = vmul.u32.u64.high %v3417_v31, %v1292_v21, %v3466_v50 }
 0x15f   : > { %v1157_v10 = vsel %vm1156_vm11, %v1155_v22, 0  ;;  %v1012_v30 = vor.u32 %v1011_v27, %v1010_v23  ;;  %v1015_v4 = vshll.u32 %v1014_v26, 23  ;;  %vm1136_vm13 = vcmp.lt.s32.totalorder %v3405_v42, 2  ;;  %v424_v26 = vpop.permute.xlu0 %423 }
 0x160   : > { %v3471_v17 = vmul.u32.u64.low %v3417_v31, %v1296_v47  ;;  %v3472_v2 = vmul.u32.u64.high %v3417_v31, %v1296_v47, %v3471_v17  ;;  %vm1137_vm14 = vcmp.eq.s32.totalorder %v3405_v42, 0  ;;  %vm1140_vm15 = vcmp.eq.s32.totalorder %v3405_v42, 2 }
 0x161   : > { %v1159_v12 = vand.u32 31, %v1157_v10  ;;  %v1016_v24 = vor.u32 4788187, %v1015_v4  ;;  %v1026_v11 = vsel %vm3447_vm7, 0, %v3437_v39  ;;  %v1153_v20 = vor.u32 8388608, %v3422_v18 }
 0x162   : > { %v2578_v36 = vpop.eup %2577  ;;  %v492_v29 = vadd.f32 %v3414_v62, %v2871_v48  ;;  %v1304_v8 = vmul.u32 %v3417_v31, %v1288_v59  ;;  %v1307_v16 = vadd.s32 1, %v3467_v28  ;;  %v1019_v41 = vcvt.s32.f32 %v1012_v30 }
 0x163   : > { %v2580_v38 = vpop.eup %2579  ;;  %v1141_v9 = vxor.u32 2147483648, %v2578_v36  ;;  %v1160_v40 = vsub.s32 32, %v1159_v12  ;;  %v1017_v46 = vand.u32 2147483647, %v1016_v24  ;;  %vm1306_vm0 = vc.u32 %v3472_v2, %v3466_v50 }
 0x164   : > { %v1138_v0 = vxor.u32 2147483648, %v2580_v38  ;;  %v1308_v18 = vsel %vm1306_vm0, %v1307_v16, %v3467_v28  ;;  %v3490_v48 = vshrl.u32 %v1157_v10, 5  ;;  %v1162_v22 = vshll.u32 %v2724_v54, %v1159_v12 }
 0x165   : > { %v1142_v39 = vsel %vm1140_vm15, %v1141_v9, %v2580_v38  ;;  %v1163_v62 = vshrl.u32 %v2725_v58, %v1160_v40  ;;  %v1020_v43 = vmul.f32 %v1019_v41, %v1017_v46  ;;  %v1309_v45 = vadd.s32 %v1308_v18, %v1304_v8 }
 0x166   : > { %v1139_v31 = vsel %vm1137_vm14, %v2578_v36, %v1138_v0  ;;  %v1165_v23 = vshll.u32 %v2725_v58, %v1159_v12  ;;  %v1166_v5 = vshrl.u32 %v2726_v63, %v1160_v40  ;;  %v1168_v32 = vshll.u32 %v2726_v63, %v1159_v12 }
 0x167   : > { %v1143_v55 = vsel %vm1136_vm13, %v1139_v31, %v1142_v39  ;;  %v1021_v15 = vxor.u32 2147483648, %v1020_v43  ;;  %v1310_v51 = vadd.s32 536870912, %v1309_v45  ;;  %v1169_v27 = vshrl.u32 %v2727_v1, %v1160_v40 }
 0x168   : > { %v1144_v59 = vsel %vm1133_vm12, nan, %v1143_v55  ;;  %v1164_v21 = vor.u32 %v1163_v62, %v1162_v22  ;;  %v1167_v33 = vor.u32 %v1166_v5, %v1165_v23  ;;  %v1171_v42 = vshll.u32 %v2727_v1, %v1159_v12 }
 0x169   : > { %2190 = vst [vmem:[%s3196_s10 + $0x28] sm:$0xff] %v1144_v59  ;;  %v1172_v47 = vshrl.u32 %v2728_v3, %v1160_v40  ;;  %v1022_v28 = vsel %vm939_vm3, %v1021_v15, %v1020_v43  ;;  %v1311_v10 = vshrl.u32 %v1310_v51, 30  ;;  %v1170_v30 = vor.u32 %v1169_v27, %v1168_v32 }
 0x16a   : > { %v1175_v37 = vshrl.u32 %v2729_v14, %v1160_v40  ;;  %v1025_v4 = vsel %vm3447_vm7, %v3212_v34, %v1022_v28  ;;  %v1174_v36 = vshll.u32 %v2728_v3, %v1159_v12  ;;  %v475_v24 = vmul.f32 %v3330_v25, %v424_v26 }
 0x16b   : > { %v1173_v17 = vor.u32 %v1172_v47, %v1171_v42  ;;  %2581 = vcosq.f32 %v1025_v4  ;;  %v1030_v38 = vadd.s32 3, %v1026_v11  ;;  %v1312_v9 = vshll.u32 %v1311_v10, 30 }
 0x16c   : > { %v3515_v8 = vshll.u32 %v1153_v20, 8  ;;  %2583 = vsinq.f32 %v1025_v4  ;;  %v1176_v16 = vor.u32 %v1175_v37, %v1174_v36  ;;  %vm1177_vm1 = vcmp.lt.s32.totalorder %v3490_v48, 1 }
 0x16d   : > { %vm1180_vm2 = vcmp.lt.s32.totalorder %v3490_v48, 4  ;;  %v3519_v0 = vsub.s32 %v1309_v45, %v1312_v9  ;;  %v1185_v46 = vsel %vm1177_vm1, %v1164_v21, %v1167_v33  ;;  %v3524_v12 = vadd.f32 %v3370_v19, %v492_v29 }
 0x16e   : > { %v1182_v7 = vsel %vm1180_vm2, %v1170_v30, 2102212464  ;;  %v1161_v11 = vshrl.u32 %v2724_v54, %v1160_v40  ;;  %vm1178_vm3 = vcmp.lt.s32.totalorder %v3490_v48, 2  ;;  %vm1179_vm4 = vcmp.lt.s32.totalorder %v3490_v48, 3 }
 0x16f   : > { %v1186_v20 = vsel %vm1180_vm2, %v1173_v17, 920167782  ;;  %v1315_v41 = vsub.s32 0, %v3519_v0  ;;  %v1335_v39 = vsub.s32 4, %v1311_v10  ;;  %v1189_v62 = vsel %vm1177_vm1, %v1167_v33, %v1170_v30 }
 0x170   : > { %v1187_v18 = vsel %vm1179_vm4, %v1170_v30, %v1186_v20  ;;  %v1181_v31 = vsel %vm1177_vm1, %v1161_v11, %v1164_v21  ;;  %v1183_v43 = vsel %vm1179_vm4, %v1167_v33, %v1182_v7  ;;  %v1190_v40 = vsel %vm1180_vm2, %v1176_v16, 1326507024 }
 0x171   : > { %v1188_v29 = vsel %vm1178_vm3, %v1185_v46, %v1187_v18  ;;  %vm1251_vm5 = vcmp.lt.s32.totalorder %v3373_v44, 0  ;;  %v2372_v45 = vmin.u32 %v1315_v41, %v3519_v0  ;;  %v1191_v22 = vsel %vm1179_vm4, %v1173_v17, %v1190_v40 }
 0x172   : > { %v491_v55 = vadd.f32 %v475_v24, %v2873_v49  ;;  %v1031_v23 = vand.u32 3, %v1030_v38  ;;  %v1192_v5 = vsel %vm1178_vm3, %v1189_v62, %v1191_v22  ;;  %v1336_v51 = vsel %vm1251_vm5, %v1335_v39, %v1311_v10  ;;  %v439_v22 = vpop.permute.xlu1 %438 }
 0x173   : > { %v3542_v32 = vmul.u32.u64.low %v3515_v8, %v1188_v29  ;;  %v3543_v59 = vmul.u32.u64.high %v3515_v8, %v1188_v29, %v3542_v32  ;;  %v1317_v15 = vclz %v2372_v45  ;;  %v1184_v27 = vsel %vm1178_vm3, %v1181_v31, %v1183_v43 }
 0x174   : > { %v3551_v26 = vmul.u32.u64.low %v3515_v8, %v1192_v5  ;;  %v3552_v21 = vmul.u32.u64.high %v3515_v8, %v1192_v5, %v3551_v26  ;;  %v1457_v49 = vand.u32 2147483647, %v3524_v12  ;;  %v1460_v33 = vand.u32 2139095040, %v3524_v12 }
 0x175   : > { %vm1029_vm6 = vweird.f32 %v3212_v34  ;;  %vm3559_vm7 = vcmp.le.f32.partialorder %v1249_v35, 0.7853982  ;;  %v2373_v47 = vadd.s32 4294967294, %v1317_v15  ;;  %v3564_v48 = vadd.f32 %v3370_v19, %v491_v55 }
 0x176   : > { %vm1033_vm8 = vcmp.eq.s32.totalorder %v1031_v23, 0  ;;  %vm1036_vm9 = vcmp.eq.s32.totalorder %v1031_v23, 2  ;;  %v1203_v28 = vadd.s32 1, %v3543_v59  ;;  %v1461_v10 = vshrl.u32 %v1460_v33, 23 }
 0x177   : > { %v1305_v30 = vadd.s32 %v3466_v50, %v3472_v2  ;;  %vm2374_vm10 = vcmp.lt.s32.totalorder %v2373_v47, 0  ;;  %v1338_v37 = vsel %vm3559_vm7, 0, %v1336_v51  ;;  %v1200_v35 = vmul.u32 %v3515_v8, %v1184_v27 }
 0x178   : > { %v2582_v4 = vpop.eup %2581  ;;  %v1320_v17 = vsel %vm2374_vm10, 0, %v2373_v47  ;;  %vm1202_vm11 = vc.u32 %v3552_v21, %v3542_v32  ;;  %v2379_v36 = vadd.s32 4294967169, %v1461_v10  ;;  %v1464_v24 = vand.u32 8388607, %v1457_v49 }
 0x179   : > { %v2584_v38 = vpop.eup %2583  ;;  %v1037_v9 = vxor.u32 2147483648, %v2582_v4  ;;  %v1321_v16 = vsub.s32 32, %v1320_v17  ;;  %v1325_v7 = vsub.s32 4294967266, %v1320_v17  ;;  %v1356_v50 = vand.u32 2139095040, %v3564_v48 }
 0x17a   : > { %v1034_v2 = vxor.u32 2147483648, %v2584_v38  ;;  %v1322_v46 = vshll.u32 %v3519_v0, %v1320_v17  ;;  %v1204_v8 = vsel %vm1202_vm11, %v1203_v28, %v3543_v59  ;;  %v1467_v11 = vadd.s32 1, %v2379_v36  ;;  %v434_v0 = vpop.permute.xlu0 %433 }
 0x17b   : > { %v1038_v20 = vsel %vm1036_vm9, %v1037_v9, %v2584_v38  ;;  %v1323_v41 = vshrl.u32 %v1305_v30, %v1321_v16  ;;  %v1326_v39 = vadd.s32 127, %v1325_v7  ;;  %v1205_v18 = vadd.s32 %v1204_v8, %v1200_v35 }
 0x17c   : > { %vm1032_vm12 = vcmp.lt.s32.totalorder %v1031_v23, 2  ;;  %v1035_v62 = vsel %vm1033_vm8, %v2582_v4, %v1034_v2  ;;  %v1342_v31 = vadd.s32 3, %v1338_v37  ;;  %vm1468_vm13 = vcmp.gt.s32.totalorder %v1467_v11, 0 }
 0x17d   : > { %v1039_v43 = vsel %vm1032_vm12, %v1035_v62, %v1038_v20  ;;  %v1324_v29 = vor.u32 %v1323_v41, %v1322_v46  ;;  %v1327_v40 = vshll.u32 %v1326_v39, 23  ;;  %v1206_v45 = vadd.s32 536870912, %v1205_v18 }
 0x17e   : > { %v1040_v55 = vsel %vm1029_vm6, nan, %v1039_v43  ;;  %v1465_v5 = vor.u32 8388608, %v1464_v24  ;;  %v1469_v59 = vsel %vm1468_vm13, %v1467_v11, 0  ;;  %v1357_v15 = vshrl.u32 %v1356_v50, 23 }
 0x17f   : > { %2189 = vst [vmem:[%s3196_s10 + $0x20] sm:$0xff] %v1040_v55  ;;  %v1328_v51 = vor.u32 4788187, %v1327_v40  ;;  %v1207_v27 = vshrl.u32 %v1206_v45, 30  ;;  %v1353_v23 = vand.u32 2147483647, %v3564_v48  ;;  %v3586_v33 = vmul.f32 %v3330_v25, %v439_v22 }
 0x180   : > { %v1471_v26 = vand.u32 31, %v1469_v59  ;;  %v3589_v47 = vmul.f32 %v3330_v25, %v434_v0  ;;  %v1331_v10 = vcvt.s32.f32 %v1324_v29  ;;  %v3591_v30 = vand.u32 3, %v1342_v31 }
 0x181   : > { %v1329_v28 = vand.u32 2147483647, %v1328_v51  ;;  %vm1147_vm14 = vcmp.lt.s32.totalorder %v3391_v6, 0  ;;  %v1208_v34 = vshll.u32 %v1207_v27, 30  ;;  %v1201_v37 = vadd.s32 %v3542_v32, %v3552_v21 }
 0x182   : > { %v1472_v35 = vsub.s32 32, %v1471_v26  ;;  %v3596_v4 = vshll.u32 %v1465_v5, 8  ;;  %v2375_v17 = vadd.s32 4294967169, %v1357_v15  ;;  %v1470_v38 = vshrl.u32 %v1469_v59, 5 }
 0x183   : > { %v1332_v36 = vmul.f32 %v1331_v10, %v1329_v28  ;;  %v3598_v24 = vsub.s32 %v1205_v18, %v1208_v34  ;;  %v3602_v9 = vand.u32 8388607, %v1353_v23  ;;  %v1231_v16 = vsub.s32 4, %v1207_v27 }
 0x184   : > { %v1474_v7 = vshll.u32 %v2724_v54, %v1471_v26  ;;  %v1475_v50 = vshrl.u32 %v2725_v58, %v1472_v35  ;;  %v1478_v2 = vshrl.u32 %v2726_v63, %v1472_v35  ;;  %vm3609_vm15 = vcmp.le.f32.partialorder %v1145_v13, 0.7853982 }
 0x185   : > { %v1333_v32 = vxor.u32 2147483648, %v1332_v36  ;;  %v1211_v46 = vsub.s32 0, %v3598_v24  ;;  %v1477_v8 = vshll.u32 %v2725_v58, %v1471_v26  ;;  %v1481_v11 = vshrl.u32 %v2727_v1, %v1472_v35 }
 0x186   : > { %v1476_v20 = vor.u32 %v1475_v50, %v1474_v7  ;;  %v1480_v41 = vshll.u32 %v2726_v63, %v1471_v26  ;;  %v1483_v39 = vshll.u32 %v2727_v1, %v1471_v26  ;;  %v1484_v18 = vshrl.u32 %v2728_v3, %v1472_v35 }
 0x187   : > { %v1334_v62 = vsel %vm1251_vm5, %v1333_v32, %v1332_v36  ;;  %v2368_v13 = vmin.u32 %v1211_v46, %v3598_v24  ;;  %v1479_v31 = vor.u32 %v1478_v2, %v1477_v8  ;;  %v1486_v43 = vshll.u32 %v2728_v3, %v1471_v26 }
 0x188   : > { %v1337_v29 = vsel %vm3559_vm7, %v3373_v44, %v1334_v62  ;;  %v1482_v40 = vor.u32 %v1481_v11, %v1480_v41  ;;  %v1485_v45 = vor.u32 %v1484_v18, %v1483_v39  ;;  %v1487_v22 = vshrl.u32 %v2729_v14, %v1472_v35 }
 0x189   : > { %2585 = vcosq.f32 %v1337_v29  ;;  %v1213_v0 = vclz %v2368_v13  ;;  %vm1489_vm0 = vcmp.lt.s32.totalorder %v1470_v38, 1  ;;  %v1363_v55 = vadd.s32 1, %v2375_v17 }
 0x18a   : > { %2587 = vsinq.f32 %v1337_v29  ;;  %v1232_v5 = vsel %vm1147_vm14, %v1231_v16, %v1207_v27  ;;  %v1473_v59 = vshrl.u32 %v2724_v54, %v1472_v35  ;;  %v1488_v15 = vor.u32 %v1487_v22, %v1486_v43 }
 0x18b   : > { %v2369_v51 = vadd.s32 4294967294, %v1213_v0  ;;  %vm1491_vm1 = vcmp.lt.s32.totalorder %v1470_v38, 3  ;;  %vm1492_vm2 = vcmp.lt.s32.totalorder %v1470_v38, 4  ;;  %v1497_v42 = vsel %vm1489_vm0, %v1476_v20, %v1479_v31 }
 0x18c   : > { %v1494_v26 = vsel %vm1492_vm2, %v1482_v40, 2102212464  ;;  %v1498_v28 = vsel %vm1492_vm2, %v1485_v45, 920167782  ;;  %v1501_v10 = vsel %vm1489_vm0, %v1479_v31, %v1482_v40  ;;  %v1502_v34 = vsel %vm1492_vm2, %v1488_v15, 1326507024 }
 0x18d   : > { %vm2370_vm3 = vcmp.lt.s32.totalorder %v2369_v51, 0  ;;  %vm1490_vm4 = vcmp.lt.s32.totalorder %v1470_v38, 2  ;;  %v1499_v17 = vsel %vm1491_vm1, %v1482_v40, %v1498_v28  ;;  %v1503_v36 = vsel %vm1491_vm1, %v1485_v45, %v1502_v34 }
 0x18e   : > { %v1216_v27 = vsel %vm2370_vm3, 0, %v2369_v51  ;;  %v1234_v35 = vsel %vm3609_vm15, 0, %v1232_v5  ;;  %v1500_v16 = vsel %vm1490_vm4, %v1497_v42, %v1499_v17  ;;  %v1504_v7 = vsel %vm1490_vm4, %v1501_v10, %v1503_v36 }
 0x18f   : > { %v1217_v50 = vsub.s32 32, %v1216_v27  ;;  %v1221_v2 = vsub.s32 4294967266, %v1216_v27  ;;  %v1493_v32 = vsel %vm1489_vm0, %v1473_v59, %v1476_v20  ;;  %v1495_v46 = vsel %vm1491_vm1, %v1479_v31, %v1494_v26 }
 0x190   : > { %v3641_v8 = vmul.u32.u64.low %v3596_v4, %v1504_v7  ;;  %v3642_v11 = vmul.u32.u64.high %v3596_v4, %v1504_v7, %v3641_v8  ;;  %v3645_v41 = vmul.u32.u64.low %v3596_v4, %v1500_v16  ;;  %v3646_v39 = vmul.u32.u64.high %v3596_v4, %v1500_v16, %v3645_v41 }
 0x191   : > { %v1218_v18 = vshll.u32 %v3598_v24, %v1216_v27  ;;  %v1219_v62 = vshrl.u32 %v1201_v37, %v1217_v50  ;;  %v1222_v13 = vadd.s32 127, %v1221_v2  ;;  %vm1364_vm5 = vcmp.gt.s32.totalorder %v1363_v55, 0 }
 0x192   : > { %vm1344_vm6 = vcmp.lt.s32.totalorder %v3591_v30, 2  ;;  %vm1345_vm7 = vcmp.eq.s32.totalorder %v3591_v30, 0  ;;  %v1238_v20 = vadd.s32 3, %v1234_v35  ;;  %v1496_v31 = vsel %vm1490_vm4, %v1493_v32, %v1495_v46 }
 0x193   : > { %v1365_v43 = vsel %vm1364_vm5, %v1363_v55, 0  ;;  %vm1341_vm8 = vweird.f32 %v3373_v44  ;;  %vm1348_vm9 = vcmp.eq.s32.totalorder %v3591_v30, 2  ;;  %v1220_v29 = vor.u32 %v1219_v62, %v1218_v18 }
 0x194   : > { %v1223_v40 = vshll.u32 %v1222_v13, 23  ;;  %v1367_v45 = vand.u32 31, %v1365_v43  ;;  %vm1514_vm10 = vc.u32 %v3642_v11, %v3645_v41  ;;  %v1515_v37 = vadd.s32 1, %v3646_v39 }
 0x195   : > { %v494_v24 = vadd.f32 %v3586_v33, %v2875_v52  ;;  %v3662_v38 = vadd.f32 %v3589_v47, %v2877_v53  ;;  %v1512_v0 = vmul.u32 %v3596_v4, %v1496_v31  ;;  %v1361_v55 = vor.u32 8388608, %v3602_v9 }
 0x196   : > { %v1224_v22 = vor.u32 4788187, %v1223_v40  ;;  %v1368_v5 = vsub.s32 32, %v1367_v45  ;;  %v2586_v59 = vpop.eup %2585  ;;  %v1227_v15 = vcvt.s32.f32 %v1220_v29  ;;  %v3666_v51 = vand.u32 3, %v1238_v20 }
 0x197   : > { %v1516_v42 = vsel %vm1514_vm10, %v1515_v37, %v3646_v39  ;;  %v3669_v26 = vshrl.u32 %v1365_v43, 5  ;;  %v2588_v28 = vpop.eup %2587  ;;  %v1349_v52 = vxor.u32 2147483648, %v2586_v59  ;;  %v1370_v53 = vshll.u32 %v2724_v54, %v1367_v45 }
 0x198   : > { %v1225_v33 = vand.u32 2147483647, %v1224_v22  ;;  %v1517_v10 = vadd.s32 %v1516_v42, %v1512_v0  ;;  %v1346_v47 = vxor.u32 2147483648, %v2588_v28  ;;  %v1371_v4 = vshrl.u32 %v2725_v58, %v1368_v5 }
 0x199   : > { %v1374_v9 = vshrl.u32 %v2726_v63, %v1368_v5  ;;  %v1377_v34 = vshrl.u32 %v2727_v1, %v1368_v5  ;;  %v1350_v17 = vsel %vm1348_vm9, %v1349_v52, %v2588_v28  ;;  %v1380_v35 = vshrl.u32 %v2728_v3, %v1368_v5 }
 0x19a   : > { %v1228_v36 = vmul.f32 %v1227_v15, %v1225_v33  ;;  %v1518_v27 = vadd.s32 536870912, %v1517_v10  ;;  %v1347_v16 = vsel %vm1345_vm7, %v2586_v59, %v1346_v47  ;;  %v1373_v7 = vshll.u32 %v2725_v58, %v1367_v45 }
 0x19b   : > { %v1376_v50 = vshll.u32 %v2726_v63, %v1367_v45  ;;  %v1379_v2 = vshll.u32 %v2727_v1, %v1367_v45  ;;  %v1351_v32 = vsel %vm1344_vm6, %v1347_v16, %v1350_v17  ;;  %v1372_v39 = vor.u32 %v1371_v4, %v1370_v53 }
 0x19c   : > { %v1229_v46 = vxor.u32 2147483648, %v1228_v36  ;;  %v1519_v8 = vshrl.u32 %v1518_v27, 30  ;;  %v1352_v18 = vsel %vm1341_vm8, nan, %v1351_v32  ;;  %v1375_v62 = vor.u32 %v1374_v9, %v1373_v7 }
 0x19d   : > { %v1382_v13 = vshll.u32 %v2728_v3, %v1367_v45  ;;  %v1383_v20 = vshrl.u32 %v2729_v14, %v1368_v5  ;;  %2192 = vst [vmem:[%s3196_s10 + $0x38] sm:$0xff] %v1352_v18  ;;  %v1378_v29 = vor.u32 %v1377_v34, %v1376_v50  ;;  %v1381_v40 = vor.u32 %v1380_v35, %v1379_v2 }
 0x19e   : > { %v1230_v31 = vsel %vm1147_vm14, %v1229_v46, %v1228_v36  ;;  %v1520_v43 = vshll.u32 %v1519_v8, 30  ;;  %v1401_v22 = vshll.u32 %v1361_v55, 8  ;;  %v3696_v44 = vadd.f32 %v3370_v19, %v494_v24 }
 0x19f   : > { %v1233_v30 = vsel %vm3609_vm15, %v3391_v6, %v1230_v31  ;;  %v1384_v37 = vor.u32 %v1383_v20, %v1382_v13  ;;  %v1369_v0 = vshrl.u32 %v2724_v54, %v1368_v5  ;;  %vm1385_vm11 = vcmp.lt.s32.totalorder %v3669_v26, 1 }
 0x1a0   : > { %2589 = vcosq.f32 %v1233_v30  ;;  %v3698_v45 = vsub.s32 %v1517_v10, %v1520_v43  ;;  %v1543_v59 = vsub.s32 4, %v1519_v8  ;;  %vm1388_vm12 = vcmp.lt.s32.totalorder %v3669_v26, 4 }
 0x1a1   : > { %2591 = vsinq.f32 %v1233_v30  ;;  %v1393_v15 = vsel %vm1385_vm11, %v1372_v39, %v1375_v62  ;;  %vm1387_vm13 = vcmp.lt.s32.totalorder %v3669_v26, 3  ;;  %v1390_v55 = vsel %vm1388_vm12, %v1378_v29, 2102212464 }
 0x1a2   : > { %v1523_v21 = vsub.s32 0, %v3698_v45  ;;  %v1394_v42 = vsel %vm1388_vm12, %v1381_v40, 920167782  ;;  %vm1386_vm14 = vcmp.lt.s32.totalorder %v3669_v26, 2  ;;  %v1397_v28 = vsel %vm1385_vm11, %v1375_v62, %v1378_v29 }
 0x1a3   : > { %v1395_v24 = vsel %vm1387_vm13, %v1378_v29, %v1394_v42  ;;  %v1398_v52 = vsel %vm1388_vm12, %v1384_v37, 1326507024  ;;  %v1389_v33 = vsel %vm1385_vm11, %v1369_v0, %v1372_v39  ;;  %v1391_v47 = vsel %vm1387_vm13, %v1375_v62, %v1390_v55 }
 0x1a4   : > { %v2380_v5 = vmin.u32 %v1523_v21, %v3698_v45  ;;  %v1396_v10 = vsel %vm1386_vm14, %v1393_v15, %v1395_v24  ;;  %v1399_v53 = vsel %vm1387_vm13, %v1381_v40, %v1398_v52  ;;  %vm1459_vm15 = vcmp.lt.s32.totalorder %v3524_v12, 0 }
 0x1a5   : > { %v1400_v4 = vsel %vm1386_vm14, %v1397_v28, %v1399_v53  ;;  %v3711_v9 = vmul.u32.u64.low %v1401_v22, %v1396_v10  ;;  %v3712_v34 = vmul.u32.u64.high %v1401_v22, %v1396_v10, %v3711_v9  ;;  %v3718_v36 = vadd.f32 %v3370_v19, %v3662_v38  ;;  %v449_v53 = vpop.permute.xlu1 %448 }
 0x1a6   : > { %v1525_v17 = vclz %v2380_v5  ;;  %vm3722_vm0 = vcmp.le.f32.partialorder %v1457_v49, 0.7853982  ;;  %v3726_v35 = vmul.u32.u64.low %v1401_v22, %v1400_v4  ;;  %v3727_v16 = vmul.u32.u64.high %v1401_v22, %v1400_v4, %v3726_v35 }
 0x1a7   : > { %v1665_v7 = vand.u32 2147483647, %v3696_v44  ;;  %v1544_v2 = vsel %vm1459_vm15, %v1543_v59, %v1519_v8  ;;  %v1392_v32 = vsel %vm1386_vm14, %v1389_v33, %v1391_v47  ;;  %v1668_v19 = vand.u32 2139095040, %v3696_v44 }
 0x1a8   : > { %v2381_v50 = vadd.s32 4294967294, %v1525_v17  ;;  %vm1240_vm1 = vcmp.lt.s32.totalorder %v3666_v51, 2  ;;  %vm1241_vm2 = vcmp.eq.s32.totalorder %v3666_v51, 0  ;;  %vm1244_vm3 = vcmp.eq.s32.totalorder %v3666_v51, 2 }
 0x1a9   : > { %v1411_v49 = vadd.s32 1, %v3712_v34  ;;  %vm1237_vm4 = vweird.f32 %v3391_v6  ;;  %v1513_v38 = vadd.s32 %v3645_v41, %v3642_v11  ;;  %v1669_v46 = vshrl.u32 %v1668_v19, 23 }
 0x1aa   : > { %vm2382_vm5 = vcmp.lt.s32.totalorder %v2381_v50, 0  ;;  %v1564_v26 = vand.u32 2139095040, %v3718_v36  ;;  %v1546_v39 = vsel %vm3722_vm0, 0, %v1544_v2  ;;  %v1408_v18 = vmul.u32 %v1401_v22, %v1392_v32 }
 0x1ab   : > { %v1528_v8 = vsel %vm2382_vm5, 0, %v2381_v50  ;;  %vm1410_vm6 = vc.u32 %v3727_v16, %v3711_v9  ;;  %v1672_v31 = vand.u32 8388607, %v1665_v7  ;;  %v2387_v29 = vadd.s32 4294967169, %v1669_v46 }
 0x1ac   : > { %v1529_v62 = vsub.s32 32, %v1528_v8  ;;  %v1533_v13 = vsub.s32 4294967266, %v1528_v8  ;;  %v1412_v20 = vsel %vm1410_vm6, %v1411_v49, %v3712_v34  ;;  %v1530_v41 = vshll.u32 %v3698_v45, %v1528_v8 }
 0x1ad   : > { %v2590_v11 = vpop.eup %2589  ;;  %v1413_v43 = vadd.s32 %v1412_v20, %v1408_v18  ;;  %v1561_v40 = vand.u32 2147483647, %v3718_v36  ;;  %v1565_v59 = vshrl.u32 %v1564_v26, 23  ;;  %v1550_v21 = vadd.s32 3, %v1546_v39 }
 0x1ae   : > { %v2592_v30 = vpop.eup %2591  ;;  %v1245_v37 = vxor.u32 2147483648, %v2590_v11  ;;  %v1531_v22 = vshrl.u32 %v1513_v38, %v1529_v62  ;;  %v1534_v0 = vadd.s32 127, %v1533_v13  ;;  %v1675_v42 = vadd.s32 1, %v2387_v29 }
 0x1af   : > { %v1242_v15 = vxor.u32 2147483648, %v2592_v30  ;;  %v1414_v55 = vadd.s32 536870912, %v1413_v43  ;;  %v1673_v45 = vor.u32 8388608, %v1672_v31  ;;  %v3758_v10 = vand.u32 8388607, %v1561_v40 }
 0x1b0   : > { %v1246_v24 = vsel %vm1244_vm3, %v1245_v37, %v2592_v30  ;;  %v1532_v28 = vor.u32 %v1531_v22, %v1530_v41  ;;  %v1535_v52 = vshll.u32 %v1534_v0, 23  ;;  %vm1676_vm7 = vcmp.gt.s32.totalorder %v1675_v42, 0 }
 0x1b1   : > { %v1243_v5 = vsel %vm1241_vm2, %v2590_v11, %v1242_v15  ;;  %v1415_v33 = vshrl.u32 %v1414_v55, 30  ;;  %v1677_v34 = vsel %vm1676_vm7, %v1675_v42, 0  ;;  %v2383_v17 = vadd.s32 4294967169, %v1565_v59 }
 0x1b2   : > { %v1247_v47 = vsel %vm1240_vm1, %v1243_v5, %v1246_v24  ;;  %v1536_v4 = vor.u32 4788187, %v1535_v52  ;;  %vm1355_vm8 = vcmp.lt.s32.totalorder %v3564_v48, 0  ;;  %v1539_v32 = vcvt.s32.f32 %v1532_v28 }
 0x1b3   : > { %v1248_v35 = vsel %vm1237_vm4, nan, %v1247_v47  ;;  %v1416_v50 = vshll.u32 %v1415_v33, 30  ;;  %v1679_v19 = vand.u32 31, %v1677_v34  ;;  %v3767_v49 = vmul.f32 %v3330_v25, %v449_v53 }
 0x1b4   : > { %2191 = vst [vmem:[%s3196_s10 + $0x30] sm:$0xff] %v1248_v35  ;;  %v1537_v2 = vand.u32 2147483647, %v1536_v4  ;;  %v3769_v38 = vand.u32 3, %v1550_v21  ;;  %v1409_v51 = vadd.s32 %v3711_v9, %v3727_v16  ;;  %v3775_v26 = vshll.u32 %v1673_v45, 8 }
 0x1b5   : > { %v3773_v46 = vsub.s32 %v1413_v43, %v1416_v50  ;;  %v1680_v8 = vsub.s32 32, %v1679_v19  ;;  %v1569_v39 = vor.u32 8388608, %v3758_v10  ;;  %v1571_v18 = vadd.s32 1, %v2383_v17 }
 0x1b6   : > { %v1540_v6 = vmul.f32 %v1539_v32, %v1537_v2  ;;  %v1439_v13 = vsub.s32 4, %v1415_v33  ;;  %v1678_v20 = vshrl.u32 %v1677_v34, 5  ;;  %v1682_v25 = vshll.u32 %v2724_v54, %v1679_v19 }
 0x1b7   : > { %v1419_v62 = vsub.s32 0, %v3773_v46  ;;  %v1683_v11 = vshrl.u32 %v2725_v58, %v1680_v8  ;;  %v1685_v9 = vshll.u32 %v2725_v58, %v1679_v19  ;;  %v1686_v16 = vshrl.u32 %v2726_v63, %v1680_v8 }
 0x1b8   : > { %v1541_v31 = vxor.u32 2147483648, %v1540_v6  ;;  %v1688_v43 = vshll.u32 %v2726_v63, %v1679_v19  ;;  %v1689_v29 = vshrl.u32 %v2727_v1, %v1680_v8  ;;  %v1691_v30 = vshll.u32 %v2727_v1, %v1679_v19 }
 0x1b9   : > { %v2376_v41 = vmin.u32 %v1419_v62, %v3773_v46  ;;  %v1684_v22 = vor.u32 %v1683_v11, %v1682_v25  ;;  %v1687_v0 = vor.u32 %v1686_v16, %v1685_v9  ;;  %v1692_v59 = vshrl.u32 %v2728_v3, %v1680_v8 }
 0x1ba   : > { %v1542_v37 = vsel %vm1459_vm15, %v1541_v31, %v1540_v6  ;;  %v3795_v55 = vsel %vm1355_vm8, %v1439_v13, %v1415_v33  ;;  %vm1572_vm9 = vcmp.gt.s32.totalorder %v1571_v18, 0  ;;  %v1690_v42 = vor.u32 %v1689_v29, %v1688_v43 }
 0x1bb   : > { %v1545_v15 = vsel %vm3722_vm0, %v3524_v12, %v1542_v37  ;;  %v1421_v21 = vclz %v2376_v41  ;;  %v1693_v24 = vor.u32 %v1692_v59, %v1691_v30  ;;  %vm1697_vm10 = vcmp.lt.s32.totalorder %v1678_v20, 1 }
 0x1bc   : > { %2593 = vcosq.f32 %v1545_v15  ;;  %vm3799_vm11 = vcmp.le.f32.partialorder %v1353_v23, 0.7853982  ;;  %v1694_v27 = vshll.u32 %v2728_v3, %v1679_v19  ;;  %v1695_v45 = vshrl.u32 %v2729_v14, %v1680_v8 }
 0x1bd   : > { %2595 = vsinq.f32 %v1545_v15  ;;  %v2377_v52 = vadd.s32 4294967294, %v1421_v21  ;;  %v1681_v5 = vshrl.u32 %v2724_v54, %v1680_v8  ;;  %vm1699_vm12 = vcmp.lt.s32.totalorder %v1678_v20, 3 }
 0x1be   : > { %vm1700_vm13 = vcmp.lt.s32.totalorder %v1678_v20, 4  ;;  %v1705_v33 = vsel %vm1697_vm10, %v1684_v22, %v1687_v0  ;;  %v1696_v53 = vor.u32 %v1695_v45, %v1694_v27  ;;  %vm1698_vm15 = vcmp.lt.s32.totalorder %v1678_v20, 2 }
 0x1bf   : > { %vm2378_vm14 = vcmp.lt.s32.totalorder %v2377_v52, 0  ;;  %v1702_v47 = vsel %vm1700_vm13, %v1690_v42, 2102212464  ;;  %v1706_v23 = vsel %vm1700_vm13, %v1693_v24, 920167782  ;;  %v1701_v34 = vsel %vm1697_vm10, %v1681_v5, %v1684_v22 }
 0x1c0   : > { %v1424_v4 = vsel %vm2378_vm14, 0, %v2377_v52  ;;  %v1703_v17 = vsel %vm1699_vm12, %v1687_v0, %v1702_v47  ;;  %v1707_v35 = vsel %vm1699_vm12, %v1690_v42, %v1706_v23  ;;  %v1709_v32 = vsel %vm1697_vm10, %v1687_v0, %v1690_v42 }
 0x1c1   : > { %v1425_v50 = vsub.s32 32, %v1424_v4  ;;  %v1429_v2 = vsub.s32 4294967266, %v1424_v4  ;;  %v1426_v19 = vshll.u32 %v3773_v46, %v1424_v4  ;;  %v1708_v6 = vsel %vm1698_vm15, %v1705_v33, %v1707_v35 }
 0x1c2   : > { %v1710_v8 = vsel %vm1700_vm13, %v1696_v53, 1326507024  ;;  %v1573_v62 = vsel %vm1572_vm9, %v1571_v18, 0  ;;  %v1704_v31 = vsel %vm1698_vm15, %v1701_v34, %v1703_v17  ;;  %vm1553_vm0 = vcmp.eq.s32.totalorder %v3769_v38, 0 }
 0x1c3   : > { %v1427_v13 = vshrl.u32 %v1409_v51, %v1425_v50  ;;  %v1430_v25 = vadd.s32 127, %v1429_v2  ;;  %v1711_v11 = vsel %vm1699_vm12, %v1693_v24, %v1710_v8  ;;  %v1575_v43 = vand.u32 31, %v1573_v62 }
 0x1c4   : > { %v1712_v9 = vsel %vm1698_vm15, %v1709_v32, %v1711_v11  ;;  %v3819_v16 = vmul.u32.u64.low %v3775_v26, %v1708_v6  ;;  %v3820_v41 = vmul.u32.u64.high %v3775_v26, %v1708_v6, %v3819_v16  ;;  %vm1552_vm1 = vcmp.lt.s32.totalorder %v3769_v38, 2 }
 0x1c5   : > { %v1428_v46 = vor.u32 %v1427_v13, %v1426_v19  ;;  %v1431_v29 = vshll.u32 %v1430_v25, 23  ;;  %v3825_v18 = vmul.u32.u64.low %v3775_v26, %v1712_v9  ;;  %v3826_v51 = vmul.u32.u64.high %v3775_v26, %v1712_v9, %v3825_v18 }
 0x1c6   : > { %vm1549_vm2 = vweird.f32 %v3524_v12  ;;  %vm1556_vm3 = vcmp.eq.s32.totalorder %v3769_v38, 2  ;;  %v1442_v20 = vsel %vm3799_vm11, 0, %v3795_v55  ;;  %v1576_v30 = vsub.s32 32, %v1575_v43 }
 0x1c7   : > { %v3835_v37 = vshll.u32 %v1569_v39, 8  ;;  %v1432_v22 = vor.u32 4788187, %v1431_v29  ;;  %v1720_v0 = vmul.u32 %v3775_v26, %v1704_v31  ;;  %v3838_v59 = vshrl.u32 %v1573_v62, 5 }
 0x1c8   : > { %v1578_v15 = vshll.u32 %v2724_v54, %v1575_v43  ;;  %v1723_v21 = vadd.s32 1, %v3820_v41  ;;  %v1579_v42 = vshrl.u32 %v2725_v58, %v1576_v30  ;;  %v1581_v24 = vshll.u32 %v2725_v58, %v1575_v43 }
 0x1c9   : > { %v1584_v55 = vshll.u32 %v2726_v63, %v1575_v43  ;;  %v2594_v52 = vpop.eup %2593  ;;  %v1433_v27 = vand.u32 2147483647, %v1432_v22  ;;  %v1435_v10 = vcvt.s32.f32 %v1428_v46  ;;  %vm1722_vm4 = vc.u32 %v3826_v51, %v3819_v16 }
 0x1ca   : > { %v1582_v26 = vshrl.u32 %v2726_v63, %v1576_v30  ;;  %v2596_v39 = vpop.eup %2595  ;;  %v1557_v45 = vxor.u32 2147483648, %v2594_v52  ;;  %v1724_v5 = vsel %vm1722_vm4, %v1723_v21, %v3820_v41  ;;  %v1585_v33 = vshrl.u32 %v2727_v1, %v1576_v30 }
 0x1cb   : > { %v1587_v53 = vshll.u32 %v2727_v1, %v1575_v43  ;;  %v1554_v47 = vxor.u32 2147483648, %v2596_v39  ;;  %v1436_v23 = vmul.f32 %v1435_v10, %v1433_v27  ;;  %v1725_v4 = vadd.s32 %v1724_v5, %v1720_v0 }
 0x1cc   : > { %v1590_v34 = vshll.u32 %v2728_v3, %v1575_v43  ;;  %v1558_v17 = vsel %vm1556_vm3, %v1557_v45, %v2596_v39  ;;  %v1580_v35 = vor.u32 %v1579_v42, %v1578_v15  ;;  %v1588_v50 = vshrl.u32 %v2728_v3, %v1576_v30 }
 0x1cd   : > { %v1591_v2 = vshrl.u32 %v2729_v14, %v1576_v30  ;;  %v1555_v32 = vsel %vm1553_vm0, %v2594_v52, %v1554_v47  ;;  %v1437_v19 = vxor.u32 2147483648, %v1436_v23  ;;  %v1726_v6 = vadd.s32 536870912, %v1725_v4 }
 0x1ce   : > { %v1583_v8 = vor.u32 %v1582_v26, %v1581_v24  ;;  %v1559_v62 = vsel %vm1552_vm1, %v1555_v32, %v1558_v17  ;;  %v1446_v13 = vadd.s32 3, %v1442_v20  ;;  %v1586_v25 = vor.u32 %v1585_v33, %v1584_v55 }
 0x1cf   : > { %v1589_v31 = vor.u32 %v1588_v50, %v1587_v53  ;;  %v1560_v11 = vsel %vm1549_vm2, nan, %v1559_v62  ;;  %v1438_v9 = vsel %vm1355_vm8, %v1437_v19, %v1436_v23  ;;  %v1727_v41 = vshrl.u32 %v1726_v6, 30  ;;  %v3901_v53 = vld [vmem:[%s4295_s2 + $0x2] ss:$0 sm:$0xff]  ;;  %v3927_v6 = vld [vmem:[%s4295_s2 + $0x1] ss:$0 sm:$0xff] }
 0x1d0   : > { %v1592_v43 = vor.u32 %v1591_v2, %v1590_v34  ;;  %2194 = vst [vmem:[%s3196_s10 + $0x48] sm:$0xff] %v1560_v11  ;;  %v1441_v46 = vsel %vm3799_vm11, %v3564_v48, %v1438_v9  ;;  %v1577_v29 = vshrl.u32 %v2724_v54, %v1576_v30  ;;  %vm1593_vm5 = vcmp.lt.s32.totalorder %v3838_v59, 1 }
 0x1d1   : > { %vm1595_vm6 = vcmp.lt.s32.totalorder %v3838_v59, 3  ;;  %2597 = vcosq.f32 %v1441_v46  ;;  %v1728_v38 = vshll.u32 %v1727_v41, 30  ;;  %vm1596_vm7 = vcmp.lt.s32.totalorder %v3838_v59, 4 }
 0x1d2   : > { %v1601_v12 = vsel %vm1593_vm5, %v1580_v35, %v1583_v8  ;;  %2599 = vsinq.f32 %v1441_v46  ;;  %v1598_v18 = vsel %vm1596_vm7, %v1586_v25, 2102212464  ;;  %v1602_v20 = vsel %vm1596_vm7, %v1589_v31, 920167782 }
 0x1d3   : > { %v1605_v22 = vsel %vm1593_vm5, %v1583_v8, %v1586_v25  ;;  %v3872_v0 = vsub.s32 %v1725_v4, %v1728_v38  ;;  %vm1594_vm8 = vcmp.lt.s32.totalorder %v3838_v59, 2  ;;  %v1603_v28 = vsel %vm1595_vm6, %v1586_v25, %v1602_v20  ;;  %v444_v4 = vpop.permute.xlu0 %443 }
 0x1d4   : > { %v1606_v30 = vsel %vm1596_vm7, %v1592_v43, 1326507024  ;;  %v1751_v15 = vsub.s32 4, %v1727_v41  ;;  %v1597_v21 = vsel %vm1593_vm5, %v1577_v29, %v1580_v35  ;;  %v1604_v42 = vsel %vm1594_vm8, %v1601_v12, %v1603_v28 }
 0x1d5   : > { %v1607_v24 = vsel %vm1595_vm6, %v1589_v31, %v1606_v30  ;;  %v1731_v55 = vsub.s32 0, %v3872_v0  ;;  %v1599_v52 = vsel %vm1595_vm6, %v1583_v8, %v1598_v18  ;;  %v496_v10 = vadd.f32 %v3767_v49, %v2879_v56 }
 0x1d6   : > { %v1608_v27 = vsel %vm1594_vm8, %v1605_v22, %v1607_v24  ;;  %v3893_v45 = vmul.u32.u64.low %v3835_v37, %v1604_v42  ;;  %v3894_v5 = vmul.u32.u64.high %v3835_v37, %v1604_v42, %v3893_v45  ;;  %v1600_v56 = vsel %vm1594_vm8, %v1597_v21, %v1599_v52 }
 0x1d7   : > { %v3889_v26 = vmul.u32.u64.low %v3835_v37, %v1608_v27  ;;  %v3890_v39 = vmul.u32.u64.high %v3835_v37, %v1608_v27, %v3889_v26  ;;  %v2388_v33 = vmin.u32 %v1731_v55, %v3872_v0  ;;  %v3904_v47 = vadd.f32 %v3901_v53, %v496_v10 }
 0x1d8   : > { %v1447_v49 = vand.u32 3, %v1446_v13  ;;  %vm1667_vm9 = vcmp.lt.s32.totalorder %v3696_v44, 0  ;;  %v1619_v17 = vadd.s32 1, %v3894_v5  ;;  %v1616_v50 = vmul.u32 %v3835_v37, %v1600_v56 }
 0x1d9   : > { %v1733_v23 = vclz %v2388_v33  ;;  %v1752_v34 = vsel %vm1667_vm9, %v1751_v15, %v1727_v41  ;;  %vm1618_vm10 = vc.u32 %v3890_v39, %v3893_v45  ;;  %v1873_v2 = vand.u32 2147483647, %v3904_v47 }
 0x1da   : > { %v1876_v59 = vand.u32 2139095040, %v3904_v47  ;;  %vm3919_vm11 = vcmp.le.f32.partialorder %v1665_v7, 0.7853982  ;;  %v1620_v19 = vsel %vm1618_vm10, %v1619_v17, %v3894_v5  ;;  %v479_v8 = vmul.f32 %v3927_v6, %v444_v4  ;;  %v459_v5 = vpop.permute.xlu1 %458 }
 0x1db   : > { %v2389_v35 = vadd.s32 4294967294, %v1733_v23  ;;  %vm1449_vm12 = vcmp.eq.s32.totalorder %v1447_v49, 0  ;;  %v1621_v37 = vadd.s32 %v1620_v19, %v1616_v50  ;;  %vm1452_vm14 = vcmp.eq.s32.totalorder %v1447_v49, 2 }
 0x1dc   : > { %v1877_v62 = vshrl.u32 %v1876_v59, 23  ;;  %v1721_v7 = vadd.s32 %v3819_v16, %v3826_v51  ;;  %v1754_v31 = vsel %vm3919_vm11, 0, %v1752_v34  ;;  %v1880_v46 = vand.u32 8388607, %v1873_v2 }
 0x1dd   : > { %vm2390_vm13 = vcmp.lt.s32.totalorder %v2389_v35, 0  ;;  %v1622_v38 = vadd.s32 536870912, %v1621_v37  ;;  %v495_v18 = vadd.f32 %v479_v8, %v2881_v57  ;;  %vm1448_vm15 = vcmp.lt.s32.totalorder %v1447_v49, 2 }
 0x1de   : > { %v2598_v13 = vpop.eup %2597  ;;  %v1736_v25 = vsel %vm2390_vm13, 0, %v2389_v35  ;;  %v2395_v12 = vadd.s32 4294967169, %v1877_v62  ;;  %vm1445_vm0 = vweird.f32 %v3564_v48  ;;  %v1758_v52 = vadd.s32 3, %v1754_v31 }
 0x1df   : > { %v2600_v11 = vpop.eup %2599  ;;  %v1453_v9 = vxor.u32 2147483648, %v2598_v13  ;;  %v1737_v41 = vsub.s32 32, %v1736_v25  ;;  %v1741_v43 = vsub.s32 4294967266, %v1736_v25  ;;  %v1738_v16 = vshll.u32 %v3872_v0, %v1736_v25 }
 0x1e0   : > { %v1450_v29 = vxor.u32 2147483648, %v2600_v11  ;;  %v3939_v30 = vshrl.u32 %v1622_v38, 30  ;;  %v1883_v15 = vadd.s32 1, %v2395_v12  ;;  %v1881_v27 = vor.u32 8388608, %v1880_v46 }
 0x1e1   : > { %v1454_v20 = vsel %vm1452_vm14, %v1453_v9, %v2600_v11  ;;  %v1739_v51 = vshrl.u32 %v1721_v7, %v1737_v41  ;;  %v1742_v22 = vadd.s32 127, %v1741_v43  ;;  %v3945_v26 = vadd.f32 %v3901_v53, %v495_v18 }
 0x1e2   : > { %v1451_v28 = vsel %vm1449_vm12, %v2598_v13, %v1450_v29  ;;  %v1624_v57 = vshll.u32 %v3939_v30, 30  ;;  %vm1884_vm1 = vcmp.gt.s32.totalorder %v1883_v15, 0  ;;  %v3949_v23 = vand.u32 3, %v1758_v52 }
 0x1e3   : > { %v1455_v21 = vsel %vm1448_vm15, %v1451_v28, %v1454_v20  ;;  %v1740_v42 = vor.u32 %v1739_v51, %v1738_v16  ;;  %v1743_v24 = vshll.u32 %v1742_v22, 23  ;;  %v1885_v10 = vsel %vm1884_vm1, %v1883_v15, 0 }
 0x1e4   : > { %v1456_v55 = vsel %vm1445_vm0, nan, %v1455_v21  ;;  %v3947_v33 = vsub.s32 %v1621_v37, %v1624_v57  ;;  %v1887_v56 = vand.u32 31, %v1885_v10  ;;  %v3953_v17 = vmul.f32 %v3927_v6, %v459_v5 }
 0x1e5   : > { %2193 = vst [vmem:[%s3196_s10 + $0x40] sm:$0xff] %v1456_v55  ;;  %v1744_v0 = vor.u32 4788187, %v1743_v24  ;;  %v1747_v49 = vcvt.s32.f32 %v1740_v42  ;;  %v1617_v50 = vadd.s32 %v3893_v45, %v3890_v39  ;;  %v3957_v59 = vshll.u32 %v1881_v27, 8 }
 0x1e6   : > { %v1627_v4 = vsub.s32 0, %v3947_v33  ;;  %v1888_v34 = vsub.s32 32, %v1887_v56  ;;  %v1772_v19 = vand.u32 2139095040, %v3945_v26  ;;  %v1647_v37 = vsub.s32 4, %v3939_v30 }
 0x1e7   : > { %v1745_v48 = vand.u32 2147483647, %v1744_v0  ;;  %v1890_v62 = vshll.u32 %v2724_v54, %v1887_v56  ;;  %v1886_v45 = vshrl.u32 %v1885_v10, 5  ;;  %v1893_v9 = vshll.u32 %v2725_v58, %v1887_v56 }
 0x1e8   : > { %v2384_v8 = vmin.u32 %v1627_v4, %v3947_v33  ;;  %v1891_v13 = vshrl.u32 %v2725_v58, %v1888_v34  ;;  %v1894_v25 = vshrl.u32 %v2726_v63, %v1888_v34  ;;  %v1897_v31 = vshrl.u32 %v2727_v1, %v1888_v34 }
 0x1e9   : > { %v1748_v35 = vmul.f32 %v1747_v49, %v1745_v48  ;;  %v1900_v11 = vshrl.u32 %v2728_v3, %v1888_v34  ;;  %v1896_v41 = vshll.u32 %v2726_v63, %v1887_v56  ;;  %v1899_v29 = vshll.u32 %v2727_v1, %v1887_v56 }
 0x1ea   : > { %v1629_v39 = vclz %v2384_v8  ;;  %v1892_v46 = vor.u32 %v1891_v13, %v1890_v62  ;;  %v1773_v38 = vshrl.u32 %v1772_v19, 23  ;;  %v1895_v20 = vor.u32 %v1894_v25, %v1893_v9  ;;  %v454_v19 = vpop.permute.xlu0 %453 }
 0x1eb   : > { %v1749_v7 = vxor.u32 2147483648, %v1748_v35  ;;  %v1898_v16 = vor.u32 %v1897_v31, %v1896_v41  ;;  %v1901_v51 = vor.u32 %v1900_v11, %v1899_v29  ;;  %v1902_v22 = vshll.u32 %v2728_v3, %v1887_v56 }
 0x1ec   : > { %v2385_v18 = vadd.s32 4294967294, %v1629_v39  ;;  %v1903_v28 = vshrl.u32 %v2729_v14, %v1888_v34  ;;  %vm1563_vm2 = vcmp.lt.s32.totalorder %v3718_v36, 0  ;;  %v1889_v15 = vshrl.u32 %v2724_v54, %v1888_v34 }
 0x1ed   : > { %v1750_v43 = vsel %vm1667_vm9, %v1749_v7, %v1748_v35  ;;  %vm1905_vm4 = vcmp.lt.s32.totalorder %v1886_v45, 1  ;;  %vm1906_vm5 = vcmp.lt.s32.totalorder %v1886_v45, 2  ;;  %vm1908_vm6 = vcmp.lt.s32.totalorder %v1886_v45, 4 }
 0x1ee   : > { %v1753_v12 = vsel %vm3919_vm11, %v3696_v44, %v1750_v43  ;;  %vm2386_vm3 = vcmp.lt.s32.totalorder %v2385_v18, 0  ;;  %v1904_v42 = vor.u32 %v1903_v28, %v1902_v22  ;;  %vm1907_vm7 = vcmp.lt.s32.totalorder %v1886_v45, 3 }
 0x1ef   : > { %2601 = vcosq.f32 %v1753_v12  ;;  %v1632_v21 = vsel %vm2386_vm3, 0, %v2385_v18  ;;  %v1910_v55 = vsel %vm1908_vm6, %v1898_v16, 2102212464  ;;  %v1913_v57 = vsel %vm1905_vm4, %v1892_v46, %v1895_v20 }
 0x1f0   : > { %2603 = vsinq.f32 %v1753_v12  ;;  %v1633_v32 = vsub.s32 32, %v1632_v21  ;;  %v1637_v24 = vsub.s32 4294967266, %v1632_v21  ;;  %v1634_v52 = vshll.u32 %v3947_v33, %v1632_v21 }
 0x1f1   : > { %v1914_v0 = vsel %vm1908_vm6, %v1901_v51, 920167782  ;;  %v1917_v27 = vsel %vm1905_vm4, %v1895_v20, %v1898_v16  ;;  %v1918_v48 = vsel %vm1908_vm6, %v1904_v42, 1326507024  ;;  %v1909_v49 = vsel %vm1905_vm4, %v1889_v15, %v1892_v46 }
 0x1f2   : > { %v1635_v10 = vshrl.u32 %v1617_v50, %v1633_v32  ;;  %v1638_v5 = vadd.s32 127, %v1637_v24  ;;  %v1915_v56 = vsel %vm1907_vm7, %v1898_v16, %v1914_v0  ;;  %v1919_v34 = vsel %vm1907_vm7, %v1901_v51, %v1918_v48 }
 0x1f3   : > { %v1916_v4 = vsel %vm1906_vm5, %v1913_v57, %v1915_v56  ;;  %v2391_v35 = vadd.s32 4294967169, %v1773_v38  ;;  %v1911_v62 = vsel %vm1907_vm7, %v1895_v20, %v1910_v55  ;;  %v1920_v13 = vsel %vm1906_vm5, %v1917_v27, %v1919_v34 }
 0x1f4   : > { %v1636_v8 = vor.u32 %v1635_v10, %v1634_v52  ;;  %v1639_v33 = vshll.u32 %v1638_v5, 23  ;;  %v3989_v50 = vmul.u32.u64.low %v3957_v59, %v1920_v13  ;;  %v3990_v7 = vmul.u32.u64.high %v3957_v59, %v1920_v13, %v3989_v50 }
 0x1f5   : > { %v3993_v25 = vmul.u32.u64.low %v3957_v59, %v1916_v4  ;;  %v3994_v31 = vmul.u32.u64.high %v3957_v59, %v1916_v4, %v3993_v25  ;;  %vm3999_vm8 = vcmp.le.f32.partialorder %v1561_v40, 0.7853982  ;;  %v1779_v9 = vadd.s32 1, %v2391_v35 }
 0x1f6   : > { %v1640_v39 = vor.u32 4788187, %v1639_v33  ;;  %v481_v41 = vmul.f32 %v3927_v6, %v454_v19  ;;  %vm1757_vm9 = vweird.f32 %v3696_v44  ;;  %vm1760_vm10 = vcmp.lt.s32.totalorder %v3949_v23, 2 }
 0x1f7   : > { %v1648_v43 = vsel %vm1563_vm2, %v1647_v37, %v3939_v30  ;;  %v1912_v46 = vsel %vm1906_vm5, %v1909_v49, %v1911_v62  ;;  %v1769_v29 = vand.u32 2147483647, %v3945_v26  ;;  %vm1761_vm11 = vcmp.eq.s32.totalorder %v3949_v23, 0 }
 0x1f8   : > { %v1641_v40 = vand.u32 2147483647, %v1640_v39  ;;  %v1643_v38 = vcvt.s32.f32 %v1636_v8  ;;  %vm1780_vm12 = vcmp.gt.s32.totalorder %v1779_v9, 0  ;;  %vm1930_vm13 = vc.u32 %v3990_v7, %v3993_v25 }
 0x1f9   : > { %v1931_v6 = vadd.s32 1, %v3994_v31  ;;  %v1781_v12 = vsel %vm1780_vm12, %v1779_v9, 0  ;;  %v498_v18 = vadd.f32 %v3953_v17, %v2883_v60  ;;  %v1650_v37 = vsel %vm3999_vm8, 0, %v1648_v43 }
 0x1fa   : > { %v1644_v30 = vmul.f32 %v1643_v38, %v1641_v40  ;;  %v1928_v45 = vmul.u32 %v3957_v59, %v1912_v46  ;;  %v1783_v16 = vand.u32 31, %v1781_v12  ;;  %vm1764_vm14 = vcmp.eq.s32.totalorder %v3949_v23, 2 }
 0x1fb   : > { %v1932_v28 = vsel %vm1930_vm13, %v1931_v6, %v3994_v31  ;;  %v1776_v15 = vand.u32 8388607, %v1769_v29  ;;  %v1654_v24 = vadd.s32 3, %v1650_v37  ;;  %v4026_v59 = vadd.f32 %v3901_v53, %v498_v18 }
 0x1fc   : > { %v2602_v20 = vpop.eup %2601  ;;  %v1645_v42 = vxor.u32 2147483648, %v1644_v30  ;;  %v1933_v60 = vadd.s32 %v1932_v28, %v1928_v45  ;;  %v1784_v17 = vsub.s32 32, %v1783_v16  ;;  %v1786_v55 = vshll.u32 %v2724_v54, %v1783_v16 }
 0x1fd   : > { %v2604_v51 = vpop.eup %2603  ;;  %v1765_v22 = vxor.u32 2147483648, %v2602_v20  ;;  %v1789_v27 = vshll.u32 %v2725_v58, %v1783_v16  ;;  %v1782_v23 = vshrl.u32 %v1781_v12, 5  ;;  %v1792_v19 = vshll.u32 %v2726_v63, %v1783_v16 }
 0x1fe   : > { %v1762_v21 = vxor.u32 2147483648, %v2604_v51  ;;  %v1646_v57 = vsel %vm1563_vm2, %v1645_v42, %v1644_v30  ;;  %v1934_v0 = vadd.s32 536870912, %v1933_v60  ;;  %v1787_v56 = vshrl.u32 %v2725_v58, %v1784_v17 }
 0x1ff   : > { %v1766_v32 = vsel %vm1764_vm14, %v1765_v22, %v2604_v51  ;;  %v1649_v5 = vsel %vm3999_vm8, %v3718_v36, %v1646_v57  ;;  %v1790_v48 = vshrl.u32 %v2726_v63, %v1784_v17  ;;  %v1793_v34 = vshrl.u32 %v2727_v1, %v1784_v17 }
 0x200   : > { %v1763_v52 = vsel %vm1761_vm11, %v2602_v20, %v1762_v21  ;;  %2605 = vcosq.f32 %v1649_v5  ;;  %v4042_v4 = vshrl.u32 %v1934_v0, 30  ;;  %v1788_v35 = vor.u32 %v1787_v56, %v1786_v55 }
 0x201   : > { %v1767_v10 = vsel %vm1760_vm10, %v1763_v52, %v1766_v32  ;;  %2607 = vsinq.f32 %v1649_v5  ;;  %v1791_v33 = vor.u32 %v1790_v48, %v1789_v27  ;;  %v1795_v62 = vshll.u32 %v2727_v1, %v1783_v16 }
 0x202   : > { %v1768_v49 = vsel %vm1757_vm9, nan, %v1767_v10  ;;  %v1936_v8 = vshll.u32 %v4042_v4, 30  ;;  %v1796_v13 = vshrl.u32 %v2728_v3, %v1784_v17  ;;  %v1794_v44 = vor.u32 %v1793_v34, %v1792_v19 }
 0x203   : > { %2196 = vst [vmem:[%s3196_s10 + $0x58] sm:$0xff] %v1768_v49  ;;  %v1798_v50 = vshll.u32 %v2728_v3, %v1783_v16  ;;  %v1799_v31 = vshrl.u32 %v2729_v14, %v1784_v17  ;;  %v1655_v11 = vand.u32 3, %v1654_v24  ;;  %v497_v43 = vadd.f32 %v481_v41, %v2885_v61 }
 0x204   : > { %v4052_v39 = vsub.s32 %v1933_v60, %v1936_v8  ;;  %v1797_v9 = vor.u32 %v1796_v13, %v1795_v62  ;;  %v1777_v46 = vor.u32 8388608, %v1776_v15  ;;  %vm1801_vm15 = vcmp.lt.s32.totalorder %v1782_v23, 1 }
 0x205   : > { %v1800_v40 = vor.u32 %v1799_v31, %v1798_v50  ;;  %v2084_v38 = vand.u32 2139095040, %v4026_v59  ;;  %vm1803_vm0 = vcmp.lt.s32.totalorder %v1782_v23, 3  ;;  %vm1804_vm1 = vcmp.lt.s32.totalorder %v1782_v23, 4 }
 0x206   : > { %v1939_v6 = vsub.s32 0, %v4052_v39  ;;  %v1809_v12 = vsel %vm1801_vm15, %v1788_v35, %v1791_v33  ;;  %v1785_v18 = vshrl.u32 %v2724_v54, %v1784_v17  ;;  %v1806_v20 = vsel %vm1804_vm1, %v1794_v44, 2102212464 }
 0x207   : > { %v1810_v30 = vsel %vm1804_vm1, %v1797_v9, 920167782  ;;  %v1814_v37 = vsel %vm1804_vm1, %v1800_v40, 1326507024  ;;  %vm1802_vm2 = vcmp.lt.s32.totalorder %v1782_v23, 2  ;;  %v1813_v41 = vsel %vm1801_vm15, %v1791_v33, %v1794_v44 }
 0x208   : > { %v2396_v45 = vmin.u32 %v1939_v6, %v4052_v39  ;;  %v1811_v61 = vsel %vm1803_vm0, %v1794_v44, %v1810_v30  ;;  %vm1656_vm3 = vcmp.lt.s32.totalorder %v1655_v11, 2  ;;  %v1815_v51 = vsel %vm1803_vm0, %v1797_v9, %v1814_v37 }
 0x209   : > { %v1812_v16 = vsel %vm1802_vm2, %v1809_v12, %v1811_v61  ;;  %v1817_v22 = vshll.u32 %v1777_v46, 8  ;;  %vm1653_vm4 = vweird.f32 %v3718_v36  ;;  %vm1657_vm5 = vcmp.eq.s32.totalorder %v1655_v11, 0 }
 0x20a   : > { %vm1875_vm6 = vcmp.lt.s32.totalorder %v3904_v47, 0  ;;  %v1941_v28 = vclz %v2396_v45  ;;  %v1805_v15 = vsel %vm1801_vm15, %v1785_v18, %v1788_v35  ;;  %v1807_v21 = vsel %vm1803_vm0, %v1791_v33, %v1806_v20 }
 0x20b   : > { %v1816_v42 = vsel %vm1802_vm2, %v1813_v41, %v1815_v51  ;;  %v4069_v60 = vmul.u32.u64.low %v1817_v22, %v1812_v16  ;;  %v4070_v17 = vmul.u32.u64.high %v1817_v22, %v1812_v16, %v4069_v60  ;;  %v2085_v32 = vshrl.u32 %v2084_v38, 23 }
 0x20c   : > { %vm1660_vm7 = vcmp.eq.s32.totalorder %v1655_v11, 2  ;;  %v2397_v24 = vadd.s32 4294967294, %v1941_v28  ;;  %v4073_v55 = vmul.u32.u64.low %v1817_v22, %v1816_v42  ;;  %v4074_v52 = vmul.u32.u64.high %v1817_v22, %v1816_v42, %v4073_v55 }
 0x20d   : > { %v2606_v57 = vpop.eup %2605  ;;  %v1929_v0 = vadd.s32 %v3993_v25, %v3990_v7  ;;  %v1808_v27 = vsel %vm1802_vm2, %v1805_v15, %v1807_v21  ;;  %v2403_v10 = vadd.s32 4294967169, %v2085_v32  ;;  %v4080_v5 = vadd.f32 %v3901_v53, %v497_v43 }
 0x20e   : > { %v2608_v56 = vpop.eup %2607  ;;  %v1661_v48 = vxor.u32 2147483648, %v2606_v57  ;;  %vm2398_vm8 = vcmp.lt.s32.totalorder %v2397_v24, 0  ;;  %v1959_v49 = vsub.s32 4, %v4042_v4  ;;  %v2081_v34 = vand.u32 2147483647, %v4026_v59 }
 0x20f   : > { %v1658_v35 = vxor.u32 2147483648, %v2608_v56  ;;  %v1944_v19 = vsel %vm2398_vm8, 0, %v2397_v24  ;;  %v1827_v8 = vadd.s32 1, %v4070_v17  ;;  %v2091_v33 = vadd.s32 1, %v2403_v10 }
 0x210   : > { %v1662_v7 = vsel %vm1660_vm7, %v1661_v48, %v2608_v56  ;;  %v1945_v25 = vsub.s32 32, %v1944_v19  ;;  %v1949_v23 = vsub.s32 4294967266, %v1944_v19  ;;  %v1824_v62 = vmul.u32 %v1817_v22, %v1808_v27 }
 0x211   : > { %v1659_v53 = vsel %vm1657_vm5, %v2606_v57, %v1658_v35  ;;  %v1946_v13 = vshll.u32 %v4052_v39, %v1944_v19  ;;  %vm1826_vm9 = vc.u32 %v4074_v52, %v4069_v60  ;;  %vm2092_vm10 = vcmp.gt.s32.totalorder %v2091_v33, 0 }
 0x212   : > { %v1663_v44 = vsel %vm1656_vm3, %v1659_v53, %v1662_v7  ;;  %v1947_v50 = vshrl.u32 %v1929_v0, %v1945_v25  ;;  %v1950_v31 = vadd.s32 127, %v1949_v23  ;;  %v1828_v9 = vsel %vm1826_vm9, %v1827_v8, %v4070_v17 }
 0x213   : > { %v1664_v43 = vsel %vm1653_vm4, nan, %v1663_v44  ;;  %v1960_v46 = vsel %vm1875_vm6, %v1959_v49, %v4042_v4  ;;  %v1829_v40 = vadd.s32 %v1828_v9, %v1824_v62  ;;  %v2093_v38 = vsel %vm2092_vm10, %v2091_v33, 0 }
 0x214   : > { %2195 = vst [vmem:[%s3196_s10 + $0x50] sm:$0xff] %v1664_v43  ;;  %v1948_v39 = vor.u32 %v1947_v50, %v1946_v13  ;;  %v1951_v6 = vshll.u32 %v1950_v31, 23  ;;  %v2095_v12 = vand.u32 31, %v2093_v38  ;;  %vm4100_vm11 = vcmp.le.f32.partialorder %v1873_v2, 0.7853982 }
 0x215   : > { %v1830_v18 = vadd.s32 536870912, %v1829_v40  ;;  %v1962_v36 = vsel %vm4100_vm11, 0, %v1960_v46  ;;  %v2088_v45 = vand.u32 8388607, %v2081_v34  ;;  %v1980_v61 = vand.u32 2139095040, %v4080_v5 }
 0x216   : > { %v1952_v20 = vor.u32 4788187, %v1951_v6  ;;  %v2096_v30 = vsub.s32 32, %v2095_v12  ;;  %v1955_v37 = vcvt.s32.f32 %v1948_v39  ;;  %v2098_v2 = vshll.u32 %v2724_v54, %v2095_v12 }
 0x217   : > { %v4106_v4 = vshrl.u32 %v1830_v18, 30  ;;  %v2101_v28 = vshll.u32 %v2725_v58, %v2095_v12  ;;  %v2094_v17 = vshrl.u32 %v2093_v38, 5  ;;  %v2104_v32 = vshll.u32 %v2726_v63, %v2095_v12 }
 0x218   : > { %v1953_v41 = vand.u32 2147483647, %v1952_v20  ;;  %v2099_v16 = vshrl.u32 %v2725_v58, %v2096_v30  ;;  %v2102_v51 = vshrl.u32 %v2726_v63, %v2096_v30  ;;  %v2105_v15 = vshrl.u32 %v2727_v1, %v2096_v30 }
 0x219   : > { %v1832_v22 = vshll.u32 %v4106_v4, 30  ;;  %v2108_v21 = vshrl.u32 %v2728_v3, %v2096_v30  ;;  %v2107_v24 = vshll.u32 %v2727_v1, %v2095_v12  ;;  %v2111_v48 = vshrl.u32 %v2729_v14, %v2096_v30 }
 0x21a   : > { %v1956_v42 = vmul.f32 %v1955_v37, %v1953_v41  ;;  %v2100_v57 = vor.u32 %v2099_v16, %v2098_v2  ;;  %v2103_v0 = vor.u32 %v2102_v51, %v2101_v28  ;;  %v2106_v10 = vor.u32 %v2105_v15, %v2104_v32 }
 0x21b   : > { %v4120_v55 = vsub.s32 %v1829_v40, %v1832_v22  ;;  %v2109_v56 = vor.u32 %v2108_v21, %v2107_v24  ;;  %v1966_v49 = vadd.s32 3, %v1962_v36  ;;  %v2089_v19 = vor.u32 8388608, %v2088_v45 }
 0x21c   : > { %v1957_v27 = vxor.u32 2147483648, %v1956_v42  ;;  %v2110_v8 = vshll.u32 %v2728_v3, %v2095_v12  ;;  %v2097_v7 = vshrl.u32 %v2724_v54, %v2096_v30  ;;  %vm2113_vm12 = vcmp.lt.s32.totalorder %v2094_v17, 1 }
 0x21d   : > { %v1835_v35 = vsub.s32 0, %v4120_v55  ;;  %v1981_v25 = vshrl.u32 %v1980_v61, 23  ;;  %vm2116_vm13 = vcmp.lt.s32.totalorder %v2094_v17, 4  ;;  %v2121_v44 = vsel %vm2113_vm12, %v2100_v57, %v2103_v0 }
 0x21e   : > { %v1958_v33 = vsel %vm1875_vm6, %v1957_v27, %v1956_v42  ;;  %v2112_v53 = vor.u32 %v2111_v48, %v2110_v8  ;;  %v2118_v13 = vsel %vm2116_vm13, %v2106_v10, 2102212464  ;;  %v2122_v50 = vsel %vm2116_vm13, %v2109_v56, 920167782 }
 0x21f   : > { %v1961_v23 = vsel %vm4100_vm11, %v3904_v47, %v1958_v33  ;;  %v2392_v62 = vmin.u32 %v1835_v35, %v4120_v55  ;;  %vm2115_vm14 = vcmp.lt.s32.totalorder %v2094_v17, 3  ;;  %v2129_v9 = vshll.u32 %v2089_v19, 8 }
 0x220   : > { %2609 = vcosq.f32 %v1961_v23  ;;  %vm2114_vm15 = vcmp.lt.s32.totalorder %v2094_v17, 2  ;;  %v2117_v43 = vsel %vm2113_vm12, %v2097_v7, %v2100_v57  ;;  %v2123_v46 = vsel %vm2115_vm14, %v2106_v10, %v2122_v50 }
 0x221   : > { %2611 = vsinq.f32 %v1961_v23  ;;  %v1837_v31 = vclz %v2392_v62  ;;  %v2125_v40 = vsel %vm2113_vm12, %v2103_v0, %v2106_v10  ;;  %v2119_v39 = vsel %vm2115_vm14, %v2103_v0, %v2118_v13 }
 0x222   : > { %v2124_v6 = vsel %vm2114_vm15, %v2121_v44, %v2123_v46  ;;  %v2126_v12 = vsel %vm2116_vm13, %v2112_v53, 1326507024  ;;  %v2399_v36 = vadd.s32 4294967169, %v1981_v25  ;;  %v1825_v2 = vadd.s32 %v4069_v60, %v4074_v52 }
 0x223   : > { %v2393_v38 = vadd.s32 4294967294, %v1837_v31  ;;  %v2127_v11 = vsel %vm2115_vm14, %v2109_v56, %v2126_v12  ;;  %v4139_v18 = vmul.u32.u64.low %v2129_v9, %v2124_v6  ;;  %v4140_v20 = vmul.u32.u64.high %v2129_v9, %v2124_v6, %v4139_v18 }
 0x224   : > { %v2128_v30 = vsel %vm2114_vm15, %v2125_v40, %v2127_v11  ;;  %v1987_v41 = vadd.s32 1, %v2399_v36  ;;  %v2120_v22 = vsel %vm2114_vm15, %v2117_v43, %v2119_v39  ;;  %v1967_v28 = vand.u32 3, %v1966_v49 }
 0x225   : > { %vm2394_vm0 = vcmp.lt.s32.totalorder %v2393_v38, 0  ;;  %v4144_v45 = vmul.u32.u64.low %v2129_v9, %v2128_v30  ;;  %v4145_v61 = vmul.u32.u64.high %v2129_v9, %v2128_v30, %v4144_v45  ;;  %v2139_v15 = vadd.s32 1, %v4140_v20 }
 0x226   : > { %v1840_v37 = vsel %vm2394_vm0, 0, %v2393_v38  ;;  %v1977_v21 = vand.u32 2147483647, %v4080_v5  ;;  %vm1988_vm1 = vcmp.gt.s32.totalorder %v1987_v41, 0  ;;  %vm1965_vm2 = vweird.f32 %v3904_v47 }
 0x227   : > { %v1841_v16 = vsub.s32 32, %v1840_v37  ;;  %v1845_v51 = vsub.s32 4294967266, %v1840_v37  ;;  %v1842_v42 = vshll.u32 %v4120_v55, %v1840_v37  ;;  %v1989_v57 = vsel %vm1988_vm1, %v1987_v41, 0 }
 0x228   : > { %v2136_v0 = vmul.u32 %v2129_v9, %v2120_v22  ;;  %vm2138_vm3 = vc.u32 %v4145_v61, %v4139_v18  ;;  %v1991_v60 = vand.u32 31, %v1989_v57  ;;  %vm1771_vm4 = vcmp.lt.s32.totalorder %v3945_v26, 0 }
 0x229   : > { %v1843_v32 = vshrl.u32 %v1825_v2, %v1841_v16  ;;  %v1846_v24 = vadd.s32 127, %v1845_v51  ;;  %v2140_v27 = vsel %vm2138_vm3, %v2139_v15, %v4140_v20  ;;  %vm1968_vm5 = vcmp.lt.s32.totalorder %v1967_v28, 2 }
 0x22a   : > { %vm1969_vm6 = vcmp.eq.s32.totalorder %v1967_v28, 0  ;;  %v2141_v10 = vadd.s32 %v2140_v27, %v2136_v0  ;;  %v1992_v55 = vsub.s32 32, %v1991_v60  ;;  %vm1972_vm7 = vcmp.eq.s32.totalorder %v1967_v28, 2 }
 0x22b   : > { %v1844_v52 = vor.u32 %v1843_v32, %v1842_v42  ;;  %v1847_v17 = vshll.u32 %v1846_v24, 23  ;;  %vm4160_vm8 = vcmp.le.f32.partialorder %v1769_v29, 0.7853982  ;;  %v1855_v35 = vsub.s32 4, %v4106_v4 }
 0x22c   : > { %v1984_v19 = vand.u32 8388607, %v1977_v21  ;;  %v2142_v7 = vadd.s32 536870912, %v2141_v10  ;;  %v4167_v25 = vshrl.u32 %v1989_v57, 5  ;;  %v1994_v23 = vshll.u32 %v2724_v54, %v1991_v60 }
 0x22d   : > { %v2610_v56 = vpop.eup %2609  ;;  %v1848_v49 = vor.u32 4788187, %v1847_v17  ;;  %v1851_v13 = vcvt.s32.f32 %v1844_v52  ;;  %v1997_v29 = vshll.u32 %v2725_v58, %v1991_v60  ;;  %v1995_v31 = vshrl.u32 %v2725_v58, %v1992_v55 }
 0x22e   : > { %v2612_v8 = vpop.eup %2611  ;;  %v1973_v33 = vxor.u32 2147483648, %v2610_v56  ;;  %v4171_v50 = vshrl.u32 %v2142_v7, 30  ;;  %v2001_v9 = vshrl.u32 %v2727_v1, %v1992_v55  ;;  %v1998_v40 = vshrl.u32 %v2726_v63, %v1992_v55 }
 0x22f   : > { %v1970_v62 = vxor.u32 2147483648, %v2612_v8  ;;  %v1849_v53 = vand.u32 2147483647, %v1848_v49  ;;  %v2004_v38 = vshrl.u32 %v2728_v3, %v1992_v55  ;;  %v2000_v12 = vshll.u32 %v2726_v63, %v1991_v60 }
 0x230   : > { %v1974_v44 = vsel %vm1972_vm7, %v1973_v33, %v2612_v8  ;;  %v2144_v6 = vshll.u32 %v4171_v50, 30  ;;  %v2003_v11 = vshll.u32 %v2727_v1, %v1991_v60  ;;  %v2006_v36 = vshll.u32 %v2728_v3, %v1991_v60 }
 0x231   : > { %v1971_v43 = vsel %vm1969_vm6, %v2610_v56, %v1970_v62  ;;  %v1852_v46 = vmul.f32 %v1851_v13, %v1849_v53  ;;  %v2007_v30 = vshrl.u32 %v2729_v14, %v1992_v55  ;;  %v1856_v37 = vsel %vm1771_vm4, %v1855_v35, %v4106_v4 }
 0x232   : > { %v1975_v39 = vsel %vm1968_vm5, %v1971_v43, %v1974_v44  ;;  %v2145_v45 = vsub.s32 %v2141_v10, %v2144_v6  ;;  %v1996_v41 = vor.u32 %v1995_v31, %v1994_v23  ;;  %v2002_v2 = vor.u32 %v2001_v9, %v2000_v12 }
 0x233   : > { %v1976_v58 = vsel %vm1965_vm2, nan, %v1975_v39  ;;  %v1853_v20 = vxor.u32 2147483648, %v1852_v46  ;;  %v1999_v1 = vor.u32 %v1998_v40, %v1997_v29  ;;  %v2005_v16 = vor.u32 %v2004_v38, %v2003_v11 }
 0x234   : > { %2198 = vst [vmem:[%s3196_s10 + $0x68] sm:$0xff] %v1976_v58  ;;  %v2008_v47 = vor.u32 %v2007_v30, %v2006_v36  ;;  %v2147_v51 = vsub.s32 0, %v2145_v45  ;;  %v1985_v14 = vor.u32 8388608, %v1984_v19  ;;  %v1858_v22 = vsel %vm4160_vm8, 0, %v1856_v37 }
 0x235   : > { %v1854_v63 = vsel %vm1771_vm4, %v1853_v20, %v1852_v46  ;;  %v1993_v4 = vshrl.u32 %v2724_v54, %v1992_v55  ;;  %vm2012_vm9 = vcmp.lt.s32.totalorder %v4167_v25, 4  ;;  %vm2009_vm10 = vcmp.lt.s32.totalorder %v4167_v25, 1 }
 0x236   : > { %v1857_v3 = vsel %vm4160_vm8, %v3945_v26, %v1854_v63  ;;  %v2404_v28 = vmin.u32 %v2147_v51, %v2145_v45  ;;  %v2014_v15 = vsel %vm2012_vm9, %v2002_v2, 2102212464  ;;  %v2017_v42 = vsel %vm2009_vm10, %v1996_v41, %v1999_v1 }
 0x237   : > { %2613 = vcosq.f32 %v1857_v3  ;;  %v2018_v32 = vsel %vm2012_vm9, %v2005_v16, 920167782  ;;  %v2021_v24 = vsel %vm2009_vm10, %v1999_v1, %v2002_v2  ;;  %v2022_v57 = vsel %vm2012_vm9, %v2008_v47, 1326507024 }
 0x238   : > { %2615 = vsinq.f32 %v1857_v3  ;;  %v1862_v0 = vadd.s32 3, %v1858_v22  ;;  %v2149_v60 = vclz %v2404_v28  ;;  %vm2011_vm11 = vcmp.lt.s32.totalorder %v4167_v25, 3 }
 0x239   : > { %v2025_v52 = vshll.u32 %v1985_v14, 8  ;;  %vm2010_vm12 = vcmp.lt.s32.totalorder %v4167_v25, 2  ;;  %v2013_v17 = vsel %vm2009_vm10, %v1993_v4, %v1996_v41  ;;  %v2019_v54 = vsel %vm2011_vm11, %v2002_v2, %v2018_v32 }
 0x23a   : > { %v2023_v27 = vsel %vm2011_vm11, %v2005_v16, %v2022_v57  ;;  %v2405_v10 = vadd.s32 4294967294, %v2149_v60  ;;  %v2015_v55 = vsel %vm2011_vm11, %v1999_v1, %v2014_v15  ;;  %v2020_v56 = vsel %vm2010_vm12, %v2017_v42, %v2019_v54 }
 0x23b   : > { %v2024_v48 = vsel %vm2010_vm12, %v2021_v24, %v2023_v27  ;;  %v4205_v19 = vmul.u32.u64.low %v2025_v52, %v2020_v56  ;;  %v4206_v8 = vmul.u32.u64.high %v2025_v52, %v2020_v56, %v4205_v19  ;;  %v2016_v7 = vsel %vm2010_vm12, %v2013_v17, %v2015_v55 }
 0x23c   : > { %v4202_v49 = vmul.u32.u64.low %v2025_v52, %v2024_v48  ;;  %v4203_v35 = vmul.u32.u64.high %v2025_v52, %v2024_v48, %v4202_v49  ;;  %vm2406_vm13 = vcmp.lt.s32.totalorder %v2405_v10, 0  ;;  %v2137_v23 = vadd.s32 %v4139_v18, %v4145_v61 }
 0x23d   : > { %v2152_v33 = vsel %vm2406_vm13, 0, %v2405_v10  ;;  %v1863_v53 = vand.u32 3, %v1862_v0  ;;  %v2035_v13 = vadd.s32 1, %v4206_v8  ;;  %v2032_v9 = vmul.u32 %v2025_v52, %v2016_v7 }
 0x23e   : > { %v2153_v25 = vsub.s32 32, %v2152_v33  ;;  %v2157_v62 = vsub.s32 4294967266, %v2152_v33  ;;  %vm2034_vm14 = vc.u32 %v4203_v35, %v4205_v19  ;;  %v2154_v29 = vshll.u32 %v2145_v45, %v2152_v33 }
 0x23f   : > { %v2036_v43 = vsel %vm2034_vm14, %v2035_v13, %v4206_v8  ;;  %vm1868_vm15 = vcmp.eq.s32.totalorder %v1863_v53, 2  ;;  %vm1864_vm0 = vcmp.lt.s32.totalorder %v1863_v53, 2  ;;  %vm1865_vm1 = vcmp.eq.s32.totalorder %v1863_v53, 0 }
 0x240   : > { %v2155_v44 = vshrl.u32 %v2137_v23, %v2153_v25  ;;  %v2158_v31 = vadd.s32 127, %v2157_v62  ;;  %v2037_v39 = vadd.s32 %v2036_v43, %v2032_v9  ;;  %vm1861_vm2 = vweird.f32 %v3945_v26 }
 0x241   : > { %vm2083_vm3 = vcmp.lt.s32.totalorder %v4026_v59, 0  ;;  %v2167_v47 = vsub.s32 4, %v4171_v50  ;;  %vm2082_vm4 = vcmp.le.f32.partialorder %v2081_v34, 0.7853982  ;;  %v2033_v24 = vadd.s32 %v4205_v19, %v4203_v35 }
 0x242   : > { %v2156_v40 = vor.u32 %v2155_v44, %v2154_v29  ;;  %v2159_v38 = vshll.u32 %v2158_v31, 23  ;;  %v2038_v11 = vadd.s32 536870912, %v2037_v39  ;;  %vm2173_vm9 = vweird.f32 %v4026_v59 }
 0x243   : > { %v2168_v22 = vsel %vm2083_vm3, %v2167_v47, %v4171_v50  ;;  %vm1979_vm10 = vcmp.lt.s32.totalorder %v4080_v5, 0  ;;  %vm1978_vm11 = vcmp.le.f32.partialorder %v1977_v21, 0.7853982 }
 0x244   : > { %v2614_v46 = vpop.eup %2613  ;;  %v2160_v61 = vor.u32 4788187, %v2159_v38  ;;  %v2163_v30 = vcvt.s32.f32 %v2156_v40  ;;  %v2039_v37 = vshrl.u32 %v2038_v11, 30  ;;  %v2170_v28 = vsel %vm2082_vm4, 0, %v2168_v22 }
 0x245   : > { %v2616_v6 = vpop.eup %2615  ;;  %v1869_v12 = vxor.u32 2147483648, %v2614_v46  ;;  %v2174_v42 = vadd.s32 3, %v2170_v28 }
 0x246   : > { %v1866_v18 = vxor.u32 2147483648, %v2616_v6  ;;  %v2161_v36 = vand.u32 2147483647, %v2160_v61  ;;  %v2040_v63 = vshll.u32 %v2039_v37, 30  ;;  %v2063_v62 = vsub.s32 4, %v2039_v37 }
 0x247   : > { %v1870_v58 = vsel %vm1868_vm15, %v1869_v12, %v2616_v6  ;;  %v2175_v17 = vand.u32 3, %v2174_v42  ;;  %vm2069_vm15 = vweird.f32 %v4080_v5 }
 0x248   : > { %v1867_v20 = vsel %vm1865_vm1, %v2614_v46, %v1866_v18  ;;  %v2164_v2 = vmul.f32 %v2163_v30, %v2161_v36  ;;  %v2041_v16 = vsub.s32 %v2037_v39, %v2040_v63  ;;  %v2064_v29 = vsel %vm1979_vm10, %v2063_v62, %v2039_v37 }
 0x249   : > { %v1871_v45 = vsel %vm1864_vm0, %v1867_v20, %v1870_v58  ;;  %vm2180_vm6 = vcmp.eq.s32.totalorder %v2175_v17, 2  ;;  %vm2177_vm7 = vcmp.eq.s32.totalorder %v2175_v17, 0  ;;  %vm2176_vm8 = vcmp.lt.s32.totalorder %v2175_v17, 2 }
 0x24a   : > { %v1872_v41 = vsel %vm1861_vm2, nan, %v1871_v45  ;;  %v2165_v1 = vxor.u32 2147483648, %v2164_v2  ;;  %v2043_v51 = vsub.s32 0, %v2041_v16 }
 0x24b   : > { %2197 = vst [vmem:[%s3196_s10 + $0x60] sm:$0xff] %v1872_v41 }
 0x24c   : > { %v2166_v3 = vsel %vm2083_vm3, %v2165_v1, %v2164_v2  ;;  %v2400_v26 = vmin.u32 %v2043_v51, %v2041_v16 }
 0x24d   : > { %v2169_v14 = vsel %vm2082_vm4, %v4026_v59, %v2166_v3  ;;  %v2066_v59 = vsel %vm1978_vm11, 0, %v2064_v29 }
 0x24e   : > { %2617 = vcosq.f32 %v2169_v14  ;;  %v2045_v4 = vclz %v2400_v26  ;;  %v2070_v44 = vadd.s32 3, %v2066_v59 }
 0x24f   : > { %2619 = vsinq.f32 %v2169_v14 }
 0x250   : > { %v2401_v15 = vadd.s32 4294967294, %v2045_v4  ;;  %v2071_v31 = vand.u32 3, %v2070_v44 }
 0x252   : > { %vm2402_vm5 = vcmp.lt.s32.totalorder %v2401_v15, 0  ;;  %vm2076_vm12 = vcmp.eq.s32.totalorder %v2071_v31, 2  ;;  %vm2073_vm13 = vcmp.eq.s32.totalorder %v2071_v31, 0  ;;  %vm2072_vm14 = vcmp.lt.s32.totalorder %v2071_v31, 2 }
 0x253   : > { %v2048_v32 = vsel %vm2402_vm5, 0, %v2401_v15 }
 0x254   : > { %v2049_v57 = vsub.s32 32, %v2048_v32  ;;  %v2053_v0 = vsub.s32 4294967266, %v2048_v32  ;;  %v2050_v34 = vshll.u32 %v2041_v16, %v2048_v32 }
 0x256   : > { %v2051_v60 = vshrl.u32 %v2033_v24, %v2049_v57  ;;  %v2054_v52 = vadd.s32 127, %v2053_v0 }
 0x258   : > { %v2052_v54 = vor.u32 %v2051_v60, %v2050_v34  ;;  %v2055_v27 = vshll.u32 %v2054_v52, 23 }
 0x25a   : > { %v2056_v56 = vor.u32 4788187, %v2055_v27  ;;  %v2059_v33 = vcvt.s32.f32 %v2052_v54 }
 0x25b   : > { %v2618_v10 = vpop.eup %2617 }
 0x25c   : > { %v2620_v50 = vpop.eup %2619  ;;  %v2181_v55 = vxor.u32 2147483648, %v2618_v10  ;;  %v2057_v8 = vand.u32 2147483647, %v2056_v56 }
 0x25d   : > { %v2178_v48 = vxor.u32 2147483648, %v2620_v50 }
 0x25e   : > { %v2182_v49 = vsel %vm2180_vm6, %v2181_v55, %v2620_v50  ;;  %v2060_v7 = vmul.f32 %v2059_v33, %v2057_v8 }
 0x25f   : > { %v2179_v35 = vsel %vm2177_vm7, %v2618_v10, %v2178_v48 }
 0x260   : > { %v2183_v19 = vsel %vm2176_vm8, %v2179_v35, %v2182_v49  ;;  %v2061_v25 = vxor.u32 2147483648, %v2060_v7 }
 0x261   : > { %v2184_v23 = vsel %vm2173_vm9, nan, %v2183_v19 }
 0x262   : > { %2200 = vst [vmem:[%s3196_s10 + $0x78] sm:$0xff] %v2184_v23  ;;  %v2062_v53 = vsel %vm1979_vm10, %v2061_v25, %v2060_v7 }
 0x263   : > { %v2065_v13 = vsel %vm1978_vm11, %v4080_v5, %v2062_v53 }
 0x264   : > { %2621 = vcosq.f32 %v2065_v13 }
 0x265   : > { %2623 = vsinq.f32 %v2065_v13 }
 0x271   : > { %v2622_v9 = vpop.eup %2621 }
 0x272   : > { %v2624_v43 = vpop.eup %2623  ;;  %v2077_v46 = vxor.u32 2147483648, %v2622_v9 }
 0x273   : > { %v2074_v21 = vxor.u32 2147483648, %v2624_v43 }
 0x274   : > { %v2078_v40 = vsel %vm2076_vm12, %v2077_v46, %v2624_v43 }
 0x275   : > { %v2075_v38 = vsel %vm2073_vm13, %v2622_v9, %v2074_v21 }
 0x276   : > { %v2079_v39 = vsel %vm2072_vm14, %v2075_v38, %v2078_v40 }
 0x277   : > { %v2080_v6 = vsel %vm2069_vm15, nan, %v2079_v39 }
 0x278   : > { %2199 = vst [vmem:[%s3196_s10 + $0x70] sm:$0xff] %v2080_v6 }
 0x279   : > { %2642 = shalt.err (!%p2639_p7)
}
 0x27a   : > { %s2643_s8 = scalar_lea.hbm %s4234_s15, 2048  ;;  %s2647_s5 = scalar_lea.hbm %s4296_s3, 8192 }
 0x27b   : > { %p2644_p9 = scmp.ne.s32.totalorder %s4234_s15, %s2643_s8  ;;  %p2648_p12 = scmp.lt.s32.totalorder %s4234_s15, %s4296_s3 }
 0x27c   : > { %p2649_p13 = scmp.lt.s32.totalorder %s2647_s5, %s2643_s8 }
 0x27d   : > { %p2645_p10 = pnand %p2644_p9, %p2804_p3 }
 0x27e   : > { %p2650_p0 = por %p2649_p13, %p2648_p12 }
 0x27f   : > { %p2646_p11 = pneg %p2645_p10 }
 0x281   : > { %p2651_p1 = pnand %p2650_p0, %p2646_p11 }
 0x283   : > { %2654 = shalt.err (!%p2651_p1)
}
 0x284   : > { %s2731_s9 = smov 128   ;;  %s2732_s20 = smov 8  }
 0x285   : > { %2479 = dma.vmem_to_hbm [thread:$0]  (%p2804_p3), %s4236_s11, 2048, %s4234_s15, %s4242_s16, %s2731_s9, %s2731_s9, %s2732_s20  }
 0x286 PF: > { %p2485_p2 = scmp.ge.s32.totalorder %s2721_s19, 2  ;;  %s2233_s21 = sand.u32 1, %s2693_s12  }
 0x287   : > { %s2234_s24 = scalar_lea.sflag [#allocation3], %s2233_s21 }
 0x288   : > { %p2482_p4 = pnand %p2485_p2, %p2813_p8 }
 0x28a   : > { %p2483_p5 = pneg %p2482_p4 }
 0x28c   : > { %2688 = dma.done.wait (%p2483_p5), %s2234_s24, 2048  }
 0x28d   : > { %2690 = vsyncadd (%p2483_p5), %s2234_s24, 4294965248  ;;  %s16_s19 = sadd.s32 1, %s2721_s19   ;;  %s4327_s12 = smov %s2697_s13 }
 0x28e   : > { %p13_p6 = scmp.ge.s32.totalorder %s16_s19, 6   ;;  %s4328_s13 = smov %s2701_s14 }
 0x28f   : > { %s4329_s14 = smov %s2822_s30  ;;  %s4330_s15 = smov %s2713_s17 }
 0x290   : > { %s4331_s16 = smov %s2717_s18  ;;  %s4332_s17 = smov %s4335_s22 }
 0x291   : > { %s4333_s18 = smov %s4339_s23  ;;  %15 = sbr.rel (!%p13_p6) target bundleno = 5 (0x5), region = 72 }
 0x296   :  { %2239 = vsyncpa [#allocation3], 1 }
 0x297   :  { %2241 = vsyncpa [#allocation3 + $0x1], 1 }

</bundles_post_ra>
